<compile_context>
chip_gen: v7x
topology: tpu7x:2x2x1
jax: 0.10.0
libtpu: 0.0.40
codegen_flags: <defaults>
</compile_context>

<pallas_src>
import jax
import jax.numpy as jnp
from jax import lax
from jax.experimental import pallas as pl
from jax.experimental.pallas import tpu as pltpu


# If True, the logits matmul is fed bf16 inputs (f32 accumulation).  Argmax
# may flip on near-ties vs. an f32 reference; quantized output stays exact
# rows of V either way.  Set False for f32 parity checking.
LOGITS_IN_BF16 = True


# ----------------------------- Pallas kernel ------------------------------ #

def _mq_kernel(x_ref, k_ref, v_ref, out_ref, idx_ref, cnt_ref):
    # x_ref:   (1, D, TN)     f32 activation tile ('b c t' layout)
    # k_ref:   (O, D, M)      bf16/f32 codebook keys, lane-dense, resident
    # v_ref:   (O, D, M)      f32 codebook values, lane-dense, resident
    # out_ref: (1, D, TN)     f32 quantized sum over overlaps
    # idx_ref: (1, 1, O, 1, TN) i32 codebook indices
    # cnt_ref: (1, 1, O, 1, M)  f32 per-codebook selection counts
    x = x_ref[0]                                  # (D, TN) f32
    xq = x.astype(k_ref.dtype)                    # cast once for all overlaps
    num_overlaps, _, M = k_ref.shape
    TN = x.shape[1]

    # Hoisted loop-invariant constants (JAX does not CSE broadcasts).
    iota_m = lax.broadcasted_iota(jnp.int32, (M, TN), 0)           # (M, TN)
    ones_row = jnp.ones((1, TN), jnp.float32)

    acc = None
    # Static unroll over the (small) overlap axis: fuses all overlaps into a
    # single grid step and a single output store.
    for o in range(num_overlaps):
        # logits[j, n] = sum_d K[d, j] * x[d, n]
        # NOTE: the reference scales q by features**-0.5; eval-mode argmax is
        # invariant to that positive constant, so it is skipped.
        logits = lax.dot_general(
            k_ref[o], xq,
            dimension_numbers=(((0,), (0,)), ((), ())),
            preferred_element_type=jnp.float32)                    # (M, TN)

        # First-occurrence argmax over the codebook (sublane) axis.
        mx = jnp.max(logits, axis=0, keepdims=True)                # (1, TN)
        idx = jnp.min(jnp.where(logits >= mx, iota_m, M),
                      axis=0, keepdims=True)                       # (1, TN)
        onehot = (iota_m == idx).astype(jnp.float32)               # (M, TN)

        # Exact f32 gather of V rows via one-hot matmul on the MXU.
        q_out = lax.dot_general(
            v_ref[o], onehot,
            dimension_numbers=(((1,), (0,)), ((), ())),
            preferred_element_type=jnp.float32)                    # (D, TN)
        acc = q_out if acc is None else acc + q_out

        idx_ref[0, 0, o] = idx                                     # (1, TN)
        # Per-codebook counts (lane-dense (1, M) row) instead of writing the
        # full one-hot back to HBM.
        cnt_ref[0, 0, o] = lax.dot_general(
            ones_row, onehot,
            dimension_numbers=(((1,), (1,)), ((), ())),
            preferred_element_type=jnp.float32)                    # (1, M)

    out_ref[0] = acc


# ------------------------------ tiling ------------------------------------ #

def _round_up(x, m):
    return ((x + m - 1) // m) * m


def _pick_token_tile(n_tokens, batch, channels):
    """Token-tile (lane) width: multiple of 128, VMEM-aware cap, and at least
    two parallel grid blocks so both v7x TensorCores get work."""
    # Keep the (1, D, tn) f32 x/out tiles around <= 2 MiB each.
    cap = min(1024, max(128, ((2 * 1024 * 1024) // (4 * channels)) // 128 * 128))
    n128 = _round_up(n_tokens, 128)
    ntb = pl.cdiv(n128, cap)
    if batch * ntb < 2 and n128 > 128:
        ntb = 2                                   # v7x has 2 TensorCores/chip
    return _round_up(pl.cdiv(n128, ntb), 128)


def mq_quantize(x_bct, k_t, v_t):
    """x_bct: (B, D, N) f32; k_t: (O, D, M) bf16/f32; v_t: (O, D, M) f32.

    Returns (out (B, D, N) f32, indices (B, N, O) i32, counts (O, M) f32).
    """
    B, D, N = x_bct.shape
    O, _, M = k_t.shape

    tn = _pick_token_tile(N, B, D)
    n_padded = _round_up(N, tn)
    n_pad = n_padded - N
    if n_pad:
        x_bct = jnp.pad(x_bct, ((0, 0), (0, 0), (0, n_pad)))
    ntb = n_padded // tn

    out_shapes = (
        jax.ShapeDtypeStruct((B, D, n_padded), jnp.float32),       # quantized sum
        jax.ShapeDtypeStruct((B, ntb, O, 1, tn), jnp.int32),       # indices
        jax.ShapeDtypeStruct((B, ntb, O, 1, M), jnp.float32),      # counts
    )
    grid_spec = pltpu.PrefetchScalarGridSpec(
        num_scalar_prefetch=0,
        grid=(B, ntb),
        in_specs=[
            pl.BlockSpec((1, D, tn), lambda b, n: (b, 0, n)),
            # Constant index_map: K/V DMA'd once, resident for the whole call.
            pl.BlockSpec((O, D, M), lambda b, n: (0, 0, 0)),
            pl.BlockSpec((O, D, M), lambda b, n: (0, 0, 0)),
        ],
        out_specs=[
            pl.BlockSpec((1, D, tn), lambda b, n: (b, 0, n)),
            pl.BlockSpec((1, 1, O, 1, tn), lambda b, n: (b, n, 0, 0, 0)),
            pl.BlockSpec((1, 1, O, 1, M), lambda b, n: (b, n, 0, 0, 0)),
        ],
    )
    out, idx5, cnt5 = pl.pallas_call(
        _mq_kernel,
        out_shape=out_shapes,
        grid_spec=grid_spec,
        compiler_params=pltpu.CompilerParams(
            dimension_semantics=("parallel", "parallel"),
            vmem_limit_bytes=32 * 1024 * 1024),
    )(x_bct, k_t, v_t)

    out = out[:, :, :N]

    # (B, ntb, O, 1, tn) -> (B, ntb, tn, O) -> (B, N_pad, O) -> (B, N, O)
    indices = jnp.transpose(idx5[:, :, :, 0, :], (0, 1, 3, 2))
    indices = indices.reshape(B, n_padded, O)[:, :N, :]

    counts = jnp.sum(cnt5, axis=(0, 1, 3))                         # (O, M)
    if n_pad:
        # Zero-padded tokens have all-zero logits and (first-occurrence tie
        # break) always select code 0; remove them from the statistics.
        counts = counts.at[:, 0].add(-jnp.float32(B * n_pad))
    return out, indices, counts


# ------------------------------ JAX glue ---------------------------------- #

def mq1d_forward(x_bct, codebooks, wk, wv, with_info=True):
    """MQ1d.forward (eval mode).

    x_bct:     (B, C, T) f32
    codebooks: (O, M, C) f32   (one codebook per overlap)
    wk, wv:    (O, C, C) f32   (EinMix 'n d -> n c' weights, no bias)
    """
    B, C, T = x_bct.shape
    O, M, _ = codebooks.shape

    # k, v = to_k(codebook), to_v(codebook): tiny parameter-only matmuls.
    k = jnp.einsum("omd,odc->omc", codebooks, wk)                  # (O, M, C)
    v = jnp.einsum("omd,odc->omc", codebooks, wv)                  # (O, M, C)

    # Lane-dense (O, C, M) layout for the kernel (codebook axis on lanes).
    k_t = jnp.swapaxes(k, 1, 2)
    v_t = jnp.swapaxes(v, 1, 2)
    if LOGITS_IN_BF16:
        k_t = k_t.astype(jnp.bfloat16)   # argmax path only; halves K DMA bytes

    out, idx_bno, counts = mq_quantize(x_bct, k_t, v_t)

    # perplexity per overlap: mean one-hot over (b, n)  ->  exp(-sum p log p)
    mean = counts / jnp.float32(B * T)                             # (O, M)
    perp = jnp.exp(-jnp.sum(mean * jnp.log(mean + 1e-10),
                            axis=-1, keepdims=True))               # (O, 1)
    perplexities = [perp[i] for i in range(O)]                     # list of (1,)

    # 'b n o -> b 1 n o'
    indices = idx_bno[:, None, :, :]                               # (B,1,T,O)

    info = {"indices": indices, "perplexity": perplexities}
    return (out, info) if with_info else out


# -------------------------------- main ------------------------------------ #

if __name__ == "__main__":
    batch = 2
    channels = 32
    codebook_size = 128
    num_overlaps = 2
    seq = 256
    temperature = 1.0  # only used by the (unimplemented) training path

    key = jax.random.PRNGKey(0)
    k_cb, k_wk, k_wv, k_x = jax.random.split(key, 4)

    codebooks = jax.random.normal(
        k_cb, (num_overlaps, codebook_size, channels), dtype=jnp.float32)
    wk = jax.random.normal(
        k_wk, (num_overlaps, channels, channels), dtype=jnp.float32) * channels ** -0.5
    wv = jax.random.normal(
        k_wv, (num_overlaps, channels, channels), dtype=jnp.float32) * channels ** -0.5
    x = jax.random.normal(k_x, (batch, channels, seq), dtype=jnp.float32)

    out, info = mq1d_forward(x, codebooks, wk, wv)
    out = jax.block_until_ready(out)
    info = jax.tree_util.tree_map(jax.block_until_ready, info)

    assert out.shape == (batch, channels, seq)
    assert info["indices"].shape == (batch, 1, seq, num_overlaps)
    assert info["indices"].dtype == jnp.int32
    assert len(info["perplexity"]) == num_overlaps
    assert all(p.shape == (1,) for p in info["perplexity"])

    # Consistency check: out must equal the sum over overlaps of the selected
    # V rows (exact codebook-row gather semantics of the one-hot matmul).
    v = jnp.einsum("omd,odc->omc", codebooks, wv)                  # (O, M, C)
    idx = jnp.transpose(info["indices"][:, 0], (2, 0, 1))          # (O, B, T)
    recon = jnp.zeros_like(out)
    for o in range(num_overlaps):
        rows = jnp.take(v[o], idx[o], axis=0)                      # (B, T, C)
        recon = recon + jnp.transpose(rows, (0, 2, 1))             # (B, C, T)
    assert jnp.allclose(out, recon, atol=1e-5), "quantized output mismatch"

    print("KERNEL_OK")
</pallas_src>

<mosaic_0001>
module attributes {stable_mosaic.version = 11 : i64} {
  func.func @_mq_kernel(%arg0: i32, %arg1: i32, %arg2: memref<1x32x256xf32, #tpu.memory_space<vmem>>, %arg3: memref<2x32x128xbf16, #tpu.memory_space<vmem>>, %arg4: memref<2x32x128xf32, #tpu.memory_space<vmem>>, %arg5: memref<1x32x256xf32, #tpu.memory_space<vmem>>, %arg6: memref<1x1x2x1x256xi32, #tpu.memory_space<vmem>>, %arg7: memref<1x1x2x1x128xf32, #tpu.memory_space<vmem>>) attributes {dimension_semantics = [#tpu.dimension_semantics<parallel>, #tpu.dimension_semantics<parallel>], iteration_bounds = array<i64: 2, 1>, scalar_prefetch = 0 : i64, scratch_operands = 0 : i64, tpu.core_type = #tpu.core_type<tc>, window_params = [{transform_indices = @transform_0, window_bounds = array<i64: 1, 32, 256>}, {pipeline_mode = #tpu.pipeline_mode<synchronous>, transform_indices = @transform_1, window_bounds = array<i64: 2, 32, 128>}, {pipeline_mode = #tpu.pipeline_mode<synchronous>, transform_indices = @transform_2, window_bounds = array<i64: 2, 32, 128>}, {transform_indices = @transform_3, window_bounds = array<i64: 1, 32, 256>}, {transform_indices = @transform_4, window_bounds = array<i64: 1, 1, 2, 1, 256>}, {transform_indices = @transform_5, window_bounds = array<i64: 1, 1, 2, 1, 128>}]} {
    %c0 = arith.constant 0 : index
    %c0_0 = arith.constant 0 : index
    %c0_1 = arith.constant 0 : index
    %0 = vector.load %arg2[%c0, %c0_0, %c0_1] : memref<1x32x256xf32, #tpu.memory_space<vmem>>, vector<1x32x256xf32>
    %1 = vector.shape_cast %0 : vector<1x32x256xf32> to vector<32x256xf32>
    %2 = arith.truncf %1 : vector<32x256xf32> to vector<32x256xbf16>
    %3 = tpu.iota {dimensions = array<i32: 0>} : vector<128x256xi32>
    %cst = arith.constant 1.000000e+00 : f32
    %4 = vector.broadcast %cst : f32 to vector<1x256xf32>
    %c0_2 = arith.constant 0 : index
    %c0_3 = arith.constant 0 : index
    %c0_4 = arith.constant 0 : index
    %5 = vector.load %arg3[%c0_2, %c0_3, %c0_4] : memref<2x32x128xbf16, #tpu.memory_space<vmem>>, vector<1x32x128xbf16>
    %6 = vector.shape_cast %5 : vector<1x32x128xbf16> to vector<32x128xbf16>
    %cst_5 = arith.constant dense<0.000000e+00> : vector<128x256xf32>
    %7 = tpu.matmul %6, %2, %cst_5 {dimension_numbers = #tpu.dot_dimension_numbers<[0], [0], [1], [1], [0, 1, 1, 1], [], []>} : vector<32x128xbf16>, vector<32x256xbf16>, vector<128x256xf32> -> vector<128x256xf32>
    %cst_6 = arith.constant dense<0xFF800000> : vector<256xf32>
    %8 = vector.multi_reduction <maximumf>, %7, %cst_6 [0] : vector<128x256xf32> to vector<256xf32>
    %9 = vector.shape_cast %8 : vector<256xf32> to vector<1x256xf32>
    %10 = vector.broadcast %9 : vector<1x256xf32> to vector<128x256xf32>
    %11 = arith.cmpf oge, %7, %10 : vector<128x256xf32>
    %c128_i32 = arith.constant 128 : i32
    %12 = vector.broadcast %c128_i32 : i32 to vector<128x256xi32>
    %13 = arith.select %11, %3, %12 : vector<128x256xi1>, vector<128x256xi32>
    %cst_7 = arith.constant dense<2147483647> : vector<256xi32>
    %14 = vector.multi_reduction <minsi>, %13, %cst_7 [0] : vector<128x256xi32> to vector<256xi32>
    %15 = vector.shape_cast %14 : vector<256xi32> to vector<1x256xi32>
    %16 = vector.broadcast %15 : vector<1x256xi32> to vector<128x256xi32>
    %17 = arith.cmpi eq, %3, %16 : vector<128x256xi32>
    %18 = arith.extui %17 : vector<128x256xi1> to vector<128x256xi32>
    %19 = arith.sitofp %18 : vector<128x256xi32> to vector<128x256xf32>
    %c0_8 = arith.constant 0 : index
    %c0_9 = arith.constant 0 : index
    %c0_10 = arith.constant 0 : index
    %20 = vector.load %arg4[%c0_8, %c0_9, %c0_10] : memref<2x32x128xf32, #tpu.memory_space<vmem>>, vector<1x32x128xf32>
    %21 = vector.shape_cast %20 : vector<1x32x128xf32> to vector<32x128xf32>
    %cst_11 = arith.constant dense<0.000000e+00> : vector<32x256xf32>
    %22 = tpu.matmul %21, %19, %cst_11 {dimension_numbers = #tpu.dot_dimension_numbers<[1], [0], [0], [1], [0, 0, 1, 1], [], []>} : vector<32x128xf32>, vector<128x256xf32>, vector<32x256xf32> -> vector<32x256xf32>
    %c0_12 = arith.constant 0 : index
    %c0_13 = arith.constant 0 : index
    %c0_14 = arith.constant 0 : index
    %c0_15 = arith.constant 0 : index
    %c0_16 = arith.constant 0 : index
    %23 = vector.load %arg6[%c0_12, %c0_13, %c0_14, %c0_15, %c0_16] : memref<1x1x2x1x256xi32, #tpu.memory_space<vmem>>, vector<1x1x1x1x256xi32>
    %24 = vector.shape_cast %23 : vector<1x1x1x1x256xi32> to vector<1x256xi32>
    %25 = vector.shape_cast %15 : vector<1x256xi32> to vector<1x1x1x1x256xi32>
    tpu.vector_store %arg6[%c0_12, %c0_13, %c0_14, %c0_15, %c0_16], %25 {strides = array<i32>} : memref<1x1x2x1x256xi32, #tpu.memory_space<vmem>>, vector<1x1x1x1x256xi32>,
    %cst_17 = arith.constant dense<0.000000e+00> : vector<1x128xf32>
    %26 = tpu.matmul %4, %19, %cst_17 {dimension_numbers = #tpu.dot_dimension_numbers<[1], [1], [0], [0], [0, 0, 1, 0], [], []>} : vector<1x256xf32>, vector<128x256xf32>, vector<1x128xf32> -> vector<1x128xf32>
    %c0_18 = arith.constant 0 : index
    %c0_19 = arith.constant 0 : index
    %c0_20 = arith.constant 0 : index
    %c0_21 = arith.constant 0 : index
    %c0_22 = arith.constant 0 : index
    %27 = vector.load %arg7[%c0_18, %c0_19, %c0_20, %c0_21, %c0_22] : memref<1x1x2x1x128xf32, #tpu.memory_space<vmem>>, vector<1x1x1x1x128xf32>
    %28 = vector.shape_cast %27 : vector<1x1x1x1x128xf32> to vector<1x128xf32>
    %29 = vector.shape_cast %26 : vector<1x128xf32> to vector<1x1x1x1x128xf32>
    tpu.vector_store %arg7[%c0_18, %c0_19, %c0_20, %c0_21, %c0_22], %29 {strides = array<i32>} : memref<1x1x2x1x128xf32, #tpu.memory_space<vmem>>, vector<1x1x1x1x128xf32>,
    %c1 = arith.constant 1 : index
    %c0_23 = arith.constant 0 : index
    %c0_24 = arith.constant 0 : index
    %30 = vector.load %arg3[%c1, %c0_23, %c0_24] : memref<2x32x128xbf16, #tpu.memory_space<vmem>>, vector<1x32x128xbf16>
    %31 = vector.shape_cast %30 : vector<1x32x128xbf16> to vector<32x128xbf16>
    %cst_25 = arith.constant dense<0.000000e+00> : vector<128x256xf32>
    %32 = tpu.matmul %31, %2, %cst_25 {dimension_numbers = #tpu.dot_dimension_numbers<[0], [0], [1], [1], [0, 1, 1, 1], [], []>} : vector<32x128xbf16>, vector<32x256xbf16>, vector<128x256xf32> -> vector<128x256xf32>
    %cst_26 = arith.constant dense<0xFF800000> : vector<256xf32>
    %33 = vector.multi_reduction <maximumf>, %32, %cst_26 [0] : vector<128x256xf32> to vector<256xf32>
    %34 = vector.shape_cast %33 : vector<256xf32> to vector<1x256xf32>
    %35 = vector.broadcast %34 : vector<1x256xf32> to vector<128x256xf32>
    %36 = arith.cmpf oge, %32, %35 : vector<128x256xf32>
    %c128_i32_27 = arith.constant 128 : i32
    %37 = vector.broadcast %c128_i32_27 : i32 to vector<128x256xi32>
    %38 = arith.select %36, %3, %37 : vector<128x256xi1>, vector<128x256xi32>
    %cst_28 = arith.constant dense<2147483647> : vector<256xi32>
    %39 = vector.multi_reduction <minsi>, %38, %cst_28 [0] : vector<128x256xi32> to vector<256xi32>
    %40 = vector.shape_cast %39 : vector<256xi32> to vector<1x256xi32>
    %41 = vector.broadcast %40 : vector<1x256xi32> to vector<128x256xi32>
    %42 = arith.cmpi eq, %3, %41 : vector<128x256xi32>
    %43 = arith.extui %42 : vector<128x256xi1> to vector<128x256xi32>
    %44 = arith.sitofp %43 : vector<128x256xi32> to vector<128x256xf32>
    %c1_29 = arith.constant 1 : index
    %c0_30 = arith.constant 0 : index
    %c0_31 = arith.constant 0 : index
    %45 = vector.load %arg4[%c1_29, %c0_30, %c0_31] : memref<2x32x128xf32, #tpu.memory_space<vmem>>, vector<1x32x128xf32>
    %46 = vector.shape_cast %45 : vector<1x32x128xf32> to vector<32x128xf32>
    %cst_32 = arith.constant dense<0.000000e+00> : vector<32x256xf32>
    %47 = tpu.matmul %46, %44, %cst_32 {dimension_numbers = #tpu.dot_dimension_numbers<[1], [0], [0], [1], [0, 0, 1, 1], [], []>} : vector<32x128xf32>, vector<128x256xf32>, vector<32x256xf32> -> vector<32x256xf32>
    %48 = arith.addf %22, %47 : vector<32x256xf32>
    %c0_33 = arith.constant 0 : index
    %c0_34 = arith.constant 0 : index
    %c1_35 = arith.constant 1 : index
    %c0_36 = arith.constant 0 : index
    %c0_37 = arith.constant 0 : index
    %49 = vector.load %arg6[%c0_33, %c0_34, %c1_35, %c0_36, %c0_37] : memref<1x1x2x1x256xi32, #tpu.memory_space<vmem>>, vector<1x1x1x1x256xi32>
    %50 = vector.shape_cast %49 : vector<1x1x1x1x256xi32> to vector<1x256xi32>
    %51 = vector.shape_cast %40 : vector<1x256xi32> to vector<1x1x1x1x256xi32>
    tpu.vector_store %arg6[%c0_33, %c0_34, %c1_35, %c0_36, %c0_37], %51 {strides = array<i32>} : memref<1x1x2x1x256xi32, #tpu.memory_space<vmem>>, vector<1x1x1x1x256xi32>,
    %cst_38 = arith.constant dense<0.000000e+00> : vector<1x128xf32>
    %52 = tpu.matmul %4, %44, %cst_38 {dimension_numbers = #tpu.dot_dimension_numbers<[1], [1], [0], [0], [0, 0, 1, 0], [], []>} : vector<1x256xf32>, vector<128x256xf32>, vector<1x128xf32> -> vector<1x128xf32>
    %c0_39 = arith.constant 0 : index
    %c0_40 = arith.constant 0 : index
    %c1_41 = arith.constant 1 : index
    %c0_42 = arith.constant 0 : index
    %c0_43 = arith.constant 0 : index
    %53 = vector.load %arg7[%c0_39, %c0_40, %c1_41, %c0_42, %c0_43] : memref<1x1x2x1x128xf32, #tpu.memory_space<vmem>>, vector<1x1x1x1x128xf32>
    %54 = vector.shape_cast %53 : vector<1x1x1x1x128xf32> to vector<1x128xf32>
    %55 = vector.shape_cast %52 : vector<1x128xf32> to vector<1x1x1x1x128xf32>
    tpu.vector_store %arg7[%c0_39, %c0_40, %c1_41, %c0_42, %c0_43], %55 {strides = array<i32>} : memref<1x1x2x1x128xf32, #tpu.memory_space<vmem>>, vector<1x1x1x1x128xf32>,
    %c0_44 = arith.constant 0 : index
    %c0_45 = arith.constant 0 : index
    %c0_46 = arith.constant 0 : index
    %56 = vector.load %arg5[%c0_44, %c0_45, %c0_46] : memref<1x32x256xf32, #tpu.memory_space<vmem>>, vector<1x32x256xf32>
    %57 = vector.shape_cast %56 : vector<1x32x256xf32> to vector<32x256xf32>
    %58 = vector.shape_cast %48 : vector<32x256xf32> to vector<1x32x256xf32>
    tpu.vector_store %arg5[%c0_44, %c0_45, %c0_46], %58 {strides = array<i32>} : memref<1x32x256xf32, #tpu.memory_space<vmem>>, vector<1x32x256xf32>,
    return
  }
  func.func @transform_0(%arg0: i32, %arg1: i32) -> (i32, i32, i32) {
    %c0_i32 = arith.constant 0 : i32
    %c0_i32_0 = arith.constant 0 : i32
    return %arg0, %c0_i32, %arg1 : i32, i32, i32
  }
  func.func @transform_1(%arg0: i32, %arg1: i32) -> (i32, i32, i32) {
    %c0_i32 = arith.constant 0 : i32
    %c0_i32_0 = arith.constant 0 : i32
    %c0_i32_1 = arith.constant 0 : i32
    %c0_i32_2 = arith.constant 0 : i32
    return %c0_i32, %c0_i32_0, %c0_i32_1 : i32, i32, i32
  }
  func.func @transform_2(%arg0: i32, %arg1: i32) -> (i32, i32, i32) {
    %c0_i32 = arith.constant 0 : i32
    %c0_i32_0 = arith.constant 0 : i32
    %c0_i32_1 = arith.constant 0 : i32
    %c0_i32_2 = arith.constant 0 : i32
    return %c0_i32, %c0_i32_0, %c0_i32_1 : i32, i32, i32
  }
  func.func @transform_3(%arg0: i32, %arg1: i32) -> (i32, i32, i32) {
    %c0_i32 = arith.constant 0 : i32
    %c0_i32_0 = arith.constant 0 : i32
    return %arg0, %c0_i32, %arg1 : i32, i32, i32
  }
  func.func @transform_4(%arg0: i32, %arg1: i32) -> (i32, i32, i32, i32, i32) {
    %c0_i32 = arith.constant 0 : i32
    %c0_i32_0 = arith.constant 0 : i32
    %c0_i32_1 = arith.constant 0 : i32
    %c0_i32_2 = arith.constant 0 : i32
    return %arg0, %arg1, %c0_i32, %c0_i32_0, %c0_i32_1 : i32, i32, i32, i32, i32
  }
  func.func @transform_5(%arg0: i32, %arg1: i32) -> (i32, i32, i32, i32, i32) {
    %c0_i32 = arith.constant 0 : i32
    %c0_i32_0 = arith.constant 0 : i32
    %c0_i32_1 = arith.constant 0 : i32
    %c0_i32_2 = arith.constant 0 : i32
    return %arg0, %arg1, %c0_i32, %c0_i32_0, %c0_i32_1 : i32, i32, i32, i32, i32
  }
}

</mosaic_0001>

<bundles_post_ra>
// kernel: tpu_custom_call.1
= control target key start
LH: loop header
LB: loop body
LE: loop exit
PB: predicated region body
PF: predicated region fallthrough
CT: control target
= control target key end

     0   :  { %11 = vsyncpa [#allocation3], 0  ;;  %s4146_s0 = inlined_call_operand.hbm [shape: f32[2,32,256], index: 0, kind: input, shape index: {}]   ;;  %s4147_s1 = inlined_call_operand.hbm [shape: bf16[2,32,128], index: 1, kind: input, shape index: {}]   ;;  %s4148_s2 = inlined_call_operand.hbm [shape: f32[2,32,128], index: 2, kind: input, shape index: {}]   ;;  %s4149_s3 = inlined_call_operand.hbm [shape: f32[2,32,256], index: 3, kind: output, shape index: {0}]   ;;  %s4150_s4 = inlined_call_operand.hbm [shape: s32[2,1,2,1,256], index: 4, kind: output, shape index: {1}]   ;;  %s4151_s5 = inlined_call_operand.hbm [shape: f32[2,1,2,1,128], index: 5, kind: output, shape index: {2}]  }
   0x1   :  { %13 = vsyncpa [#allocation3 + $0x1], 0 }
   0x2   :  { %14 = vsyncpa [#allocation6], 0 }
   0x3   :  { %15 = vsyncpa [#allocation4], 0 }
   0x4   :  { %17 = vsyncpa [#allocation4 + $0x1], 0 }
   0x5   :  { %18 = vsyncpa [#allocation10], 0 }
   0x6   :  { %20 = vsyncpa [#allocation10 + $0x1], 0  ;;  %s2634_s18 = smov 0   ;;  %s2636_s19 = smov 0  }
   0x7   :  { %s2638_s20 = smov 0   ;;  %s2640_s21 = smov 0  }
   0x8   :  { %s2642_s22 = smov 0   ;;  %s2644_s23 = smov 0  }
   0x9 LB: > { %s2665_s24 = sadd.s32 4294967295, %s2580_s23   ;;  %s1855_s25 = sadd.s32 4294967294, %s2580_s23   ;;  %s2580_s23 = sphi %s2644_s23, %s26_s23   ;;  %s2576_s22 = sphi %s2642_s22, %s4336_s22   ;;  %s2572_s21 = sphi %s2640_s21, %s4335_s21   ;;  %s2568_s20 = sphi %s2638_s20, %s4334_s20   ;;  %s2564_s19 = sphi %s2636_s19, %s4333_s19   ;;  %s2560_s18 = sphi %s2634_s18, %s4332_s18  }
   0xa   : > { %p60_p0 = scmp.ne.s32.totalorder %s2564_s19, %s2560_s18  ;;  %p4152_p1 = scmp.eq.s32.totalorder %s2665_s24, 0 }
   0xb   : > { %p134_p3 = scmp.eq.s32.totalorder %s1855_s25, 1  ;;  %p1856_p5 = scmp.ge.s32.totalorder %s2580_s23, 1 }
   0xc   : > { %p2676_p4 = por %p4152_p1, %p60_p0  ;;  %p197_p7 = scmp.lt.s32.totalorder %s2580_s23, 3 }
   0xd   : > { %p2681_p6 = por %p134_p3, %p60_p0  ;;  %s2582_s29 = smov [#allocation5]  }
   0xe   : > { %s4183_s26 = scalar_select %p2676_p4, 1, 0 }
   0xf   : > { %s4184_s27 = scalar_select %p2681_p6, 1, 0 }
  0x10   : > { %p2686_p8 = pnand %p1856_p5, %p197_p7  ;;  %s209_s30 = sshll.u32 %s2582_s29, 4  ;;  %s2690_s30 = int_to_ptr.vmem [resolvable:$true] %s209_s30 }
  0x11   : > { %s2583_s7 = smov [#allocation7]   ;;  %s2348_s11 = scalar_lea.hbm %s4147_s1, 512 }
  0x12   : > { %p2251_p9 = pneg %p2686_p8  ;;  %s222_s8 = sshll.u32 %s2583_s7, 4  ;;  %s2701_s8 = int_to_ptr.vmem [resolvable:$true] %s222_s8 }
  0x13   : > { %p2349_p12 = scmp.ne.s32.totalorder %s4147_s1, %s2348_s11  ;;  %p2355_p5 = scmp.lt.u32.totalorder %s2348_s11, %s4147_s1 }
  0x14   : > { %p2697_p11 = pnand %p2251_p9, %p4152_p1 }
  0x16   : > { %p2350_p13 = pneg %p2697_p11 }
  0x18   : > { %p2351_p0 = pnand %p2350_p13, %p2349_p12 }
  0x1a   : > { %p2352_p3 = pneg %p2351_p0 }
  0x1c   : > { %p2357_p7 = pnand %p2355_p5, %p2352_p3 }
  0x1e   : > { %2360 = shalt.err (!%p2357_p7)
}
  0x1f   : > { %s2361_s16 = scalar_lea.vmem %s2690_s30, 512  ;;  %p2369_p2 = scmp.lt.s32.totalorder %s2690_s30, %s2690_s30 }
  0x20   : > { %p2362_p9 = scmp.ne.s32.totalorder %s2690_s30, %s2361_s16  ;;  %p2370_p12 = scmp.lt.s32.totalorder %s2361_s16, %s2361_s16 }
  0x22   : > { %p2364_p10 = pnand %p2362_p9, %p2350_p13  ;;  %p2371_p0 = por %p2370_p12, %p2369_p2 }
  0x24   : > { %p2365_p1 = pneg %p2364_p10 }
  0x26   : > { %p2372_p6 = pnand %p2371_p0, %p2365_p1 }
  0x28   : > { %2375 = shalt.err (!%p2372_p6)
}
  0x29   : > { %s2584_s17 = smov 64   ;;  %s2585_s29 = smov 4  }
  0x2a   : > { %2254 = dma.hbm_to_vmem [thread:$0]  (!%p2697_p11), %s4147_s1, 512, %s2690_s30, [#allocation6], %s2584_s17, %s2584_s17, %s2585_s29  }
  0x2b   : > { %s2376_s12 = scalar_lea.hbm %s4148_s2, 1024 }
  0x2c   : > { %p2377_p2 = scmp.ne.s32.totalorder %s4148_s2, %s2376_s12  ;;  %p2383_p10 = scmp.lt.u32.totalorder %s2376_s12, %s4148_s2 }
  0x2e   : > { %p2379_p1 = pnand %p2377_p2, %p2350_p13 }
  0x30   : > { %p2380_p6 = pneg %p2379_p1 }
  0x32   : > { %p2385_p3 = pnand %p2383_p10, %p2380_p6 }
  0x34   : > { %2388 = shalt.err (!%p2385_p3)
}
  0x35   : > { %s2389_s30 = scalar_lea.vmem %s2701_s8, 1024  ;;  %p2397_p12 = scmp.lt.s32.totalorder %s2701_s8, %s2701_s8 }
  0x36   : > { %p2390_p5 = scmp.ne.s32.totalorder %s2701_s8, %s2389_s30  ;;  %p2398_p0 = scmp.lt.s32.totalorder %s2389_s30, %s2389_s30 }
  0x38   : > { %p2392_p7 = pnand %p2390_p5, %p2350_p13  ;;  %p2399_p2 = por %p2398_p0, %p2397_p12 }
  0x3a   : > { %p2393_p9 = pneg %p2392_p7 }
  0x3c   : > { %p2400_p1 = pnand %p2399_p2, %p2393_p9 }
  0x3e   : > { %2403 = shalt.err (!%p2400_p1)
}
  0x3f   : > { %s2586_s17 = smov 128   ;;  %s2587_s29 = smov 8  }
  0x40   : > { %2257 = dma.hbm_to_vmem [thread:$0]  (!%p2697_p11), %s4148_s2, 1024, %s2701_s8, [#allocation6], %s2586_s17, %s2586_s17, %s2587_s29  }
  0x41   : > { %s38_s10 = sadd.s32 1, %s2576_s22  ;;  %s47_s11 = sadd.s32 1, %s2568_s20 }
  0x42   : > { %p40_p13 = scmp.ge.s32.totalorder %s38_s10, 2  ;;  %p54_p6 = scmp.ne.s32.totalorder %s2568_s20, %s2564_s19 }
  0x43   : > { %p55_p10 = scmp.eq.s32.totalorder %s2580_s23, 0  ;;  %p2274_p3 = scmp.lt.s32.totalorder %s2580_s23, 2 }
  0x44   : > { %s4338_s10 = smov (%p40_p13, %s38_s10), 0  ;;  %p4187_p7 = scmp.eq.s32.totalorder %s2665_s24, 1 }
  0x45   : > { %p56_p5 = por %p55_p10, %p54_p6  ;;  %s42_s6 = ssub.s32 %s2576_s22, %s4338_s10 }
  0x46   : > { %p2765_p9 = por %p4187_p7, %p54_p6  ;;  %s236_s13 = sand.u32 1, %s2568_s20  }
  0x47   : > { %p45_p12 = scmp.eq.s32.totalorder %s42_s6, 0  ;;  %s1860_s8 = sshll.u32 %s236_s13, 6 }
  0x48   : > { %s4188_s12 = scalar_select %p2765_p9, 1, 0 }
  0x49   : > { %s2095_s14 = sshll.u32 %s2576_s22, 10  ;;  %s240_s29 = scalar_lea.vmem [#allocation2], %s1860_s8 }
  0x4a   : > { %s2774_s15 = scalar_select %p45_p12, %s2568_s20, %s47_s11  }
  0x4b   : > { %s2779_s17 = scalar_lea.hbm %s4146_s0, %s2095_s14  ;;  %s249_s7 = sshll.u32 %s240_s29, 4  ;;  %s2787_s7 = int_to_ptr.vmem [resolvable:$true] %s249_s7 }
  0x4c   : > { %p2783_p11 = pnand %p2274_p3, %p56_p5  ;;  %s2789_s11 = scalar_lea.sflag [#allocation3], %s236_s13 }
  0x4d   : > { %s2404_s6 = scalar_lea.hbm %s2779_s17, 1024  ;;  %s2409_s16 = scalar_lea.hbm %s4146_s0, 2048 }
  0x4e   : > { %p2405_p0 = scmp.ne.s32.totalorder %s2779_s17, %s2404_s6  ;;  %p2406_p2 = pneg %p2783_p11 }
  0x4f   : > { %p2410_p6 = scmp.lt.u32.totalorder %s2779_s17, %s4146_s0  ;;  %p2411_p10 = scmp.lt.u32.totalorder %s2409_s16, %s2404_s6 }
  0x50   : > { %p2407_p1 = pnand %p2406_p2, %p2405_p0  ;;  %p2413_p5 = scmp.lt.u32.totalorder %s2404_s6, %s2779_s17 }
  0x51   : > { %p2412_p3 = por %p2411_p10, %p2410_p6 }
  0x52   : > { %p2408_p13 = pneg %p2407_p1 }
  0x53   : > { %p2414_p7 = por %p2413_p5, %p2412_p3 }
  0x55   : > { %p2415_p12 = pnand %p2414_p7, %p2408_p13 }
  0x57   : > { %2418 = shalt.err (!%p2415_p12)
}
  0x58   : > { %s2419_s13 = scalar_lea.vmem %s2787_s7, 1024  ;;  %s2588_s8 = smov [#allocation2]  }
  0x59   : > { %p2420_p0 = scmp.ne.s32.totalorder %s2787_s7, %s2419_s13  ;;  %s2424_s14 = sshll.u32 %s2588_s8, 4  ;;  %s2425_s14 = int_to_ptr.vmem [resolvable:$false] %s2424_s14 }
  0x5a   : > { %s2426_s30 = scalar_lea.vmem %s2425_s14, 2048  ;;  %p2427_p4 = scmp.lt.s32.totalorder %s2787_s7, %s2425_s14 }
  0x5b   : > { %p2422_p1 = pnand %p2420_p0, %p2406_p2  ;;  %p2428_p6 = scmp.lt.s32.totalorder %s2426_s30, %s2419_s13 }
  0x5d   : > { %p2423_p9 = pneg %p2422_p1  ;;  %p2429_p10 = por %p2428_p6, %p2427_p4 }
  0x5f   : > { %p2430_p3 = pnand %p2429_p10, %p2423_p9 }
  0x61   : > { %2433 = shalt.err (!%p2430_p3)
}
  0x62   : > { %s2589_s6 = smov 256   ;;  %s2590_s16 = smov 16  }
  0x63   : > { %2261 = dma.hbm_to_vmem [thread:$0]  (!%p2783_p11), %s2779_s17, 1024, %s2787_s7, %s2789_s11, %s2589_s6, %s2589_s6, %s2590_s16  }
  0x64   : > { %261 = sbr.rel (%p2686_p8) target bundleno = 943 (0x3af), region = 32 }
  0x6b   : > { %s2820_s29 = sand.u32 1, %s2564_s19   ;;  %p4190_p4 = scmp.ne.s32.totalorder %s4183_s26, 0 }
  0x6c   : > { %s1864_s13 = sshll.u32 %s2820_s29, 6  ;;  %s264_s8 = scalar_lea.sflag [#allocation3], %s2820_s29 }
  0x6d   : > { %s267_s14 = scalar_lea.vmem [#allocation2], %s1864_s13 }
  0x6e   : > { %2543 = dma.done.wait (%p4190_p4), %s264_s8, 1024  }
  0x6f   : > { %2545 = vsyncadd (%p4190_p4), %s264_s8, 4294966272  ;;  %p4191_p9 = scmp.eq.s32.totalorder %s2665_s24, 0 }
  0x71   : > { %2547 = dma.done.wait (%p4191_p9), [#allocation6], 1536   ;;  %p4192_p8 = pmov %p4191_p9 }
  0x72   : > { %v2591_v0 = vmov 0   ;;  %v2344_v1 = vld [vmem:[#allocation5] sm:$0xff]   ;;  %v2345_v2 = vld [vmem:[#allocation5 + $0x8] sm:$0xff]   ;;  %v2346_v3 = vld [vmem:[#allocation5 + $0x10] sm:$0xff]   ;;  %vm376_vm0 = vcmask 261120   ;;  %s1868_s26 = sshll.u32 %s2820_s29, 2 }
  0x73   : > { %2549 = vsyncadd (%p4192_p8), [#allocation6], 4294965760  ;;  %433 = vmatprep.mubr.bf16.mxu0 %v2591_v0  ;;  %360 = vxpose.xlu0.c.b16.start [1/2] (short) %v2344_v1, 128  ;;  %v2347_v4 = vld [vmem:[#allocation5 + $0x18] sm:$0xff]   ;;  %v316_v5 = vld [vmem:[%s267_s14 + $0x8] sm:$0xff]  ;;  %s3383_s28 = scalar_lea.vmem [#allocation9], %s1868_s26  ;;  %s1624_s17 = sand.u32 1, %s2665_s24  }
  0x74   : > { %906 = vxpose.xlu1.c.b16.start [1/2] (short) %v2346_v3, 128  ;;  %v318_v6 = vld [vmem:[%s267_s14 + $0x18] sm:$0xff]  ;;  %v315_v7 = vld [vmem:[%s267_s14] sm:$0xff]  ;;  %v317_v9 = vld [vmem:[%s267_s14 + $0x10] sm:$0xff]  ;;  %s2097_s7 = sshll.u32 %s2572_s21, 6  ;;  %s1663_s6 = sshll.u32 %s3383_s28, 4  ;;  %s4016_s6 = int_to_ptr.vmem [resolvable:$true] %s1663_s6 }
  0x75   : > { %v324_v8 = vpack.c.bf16 %v318_v6, %v316_v5  ;;  %v320_v10 = vld [vmem:[%s267_s14 + $0x28] sm:$0xff]  ;;  %v322_v11 = vld [vmem:[%s267_s14 + $0x38] sm:$0xff]  ;;  %v323_v12 = vpack.c.bf16 %v317_v9, %v315_v7  ;;  %v319_v14 = vld [vmem:[%s267_s14 + $0x20] sm:$0xff]  ;;  %s4013_s30 = scalar_lea.hbm %s4150_s4, %s2097_s7  ;;  %s4018_s16 = scalar_lea.sflag [#allocation10], %s1624_s17 }
  0x76   : > { %v326_v13 = vpack.c.bf16 %v322_v11, %v320_v10  ;;  %v321_v15 = vld [vmem:[%s267_s14 + $0x30] sm:$0xff]  ;;  %s2434_s8 = scalar_lea.vmem %s4016_s6, 64  ;;  %p4329_p2 = scmp.ne.s32.totalorder %s4188_s12, 0 }
  0x77   : > { %361 = vxpose.xlu0.c.b16.end [2/2] (short) %v2345_v2, 128  ;;  %401 = vmatprep.subr.bf16.mxu0 %v324_v8  ;;  %v325_v16 = vpack.c.bf16 %v321_v15, %v319_v14  ;;  %p2435_p11 = scmp.ne.s32.totalorder %s4016_s6, %s2434_s8  ;;  %s2596_s24 = smov [#allocation9]  }
  0x78   : > { %907 = vxpose.xlu1.c.b16.end [2/2] (short) %v2347_v4, 128  ;;  %402 = vmatpush1.bf16.msra.mxu0 %v323_v12  ;;  %s2438_s14 = sshll.u32 %s2596_s24, 4  ;;  %s2439_s14 = int_to_ptr.vmem [resolvable:$false] %s2438_s14 }
  0x79   : > { %403 = vmatprep.subr.bf16.mxu0 %v326_v13  ;;  %p2436_p13 = pnand %p2435_p11, %p4329_p2  ;;  %s2440_s26 = scalar_lea.vmem %s2439_s14, 128 }
  0x7a   : > { %p2441_p7 = scmp.lt.s32.totalorder %s4016_s6, %s2439_s14  ;;  %p2442_p12 = scmp.lt.s32.totalorder %s2440_s26, %s2434_s8 }
  0x7b   : > { %p2437_p5 = pneg %p2436_p13 }
  0x7c   : > { %404 = vmatpush1.bf16.msra.mxu0 %v325_v16  ;;  %p2443_p0 = por %p2442_p12, %p2441_p7 }
  0x7d   : > { %946 = vmatprep.subr.bf16.mxu0 %v324_v8 }
  0x7e   : > { %p2444_p1 = pnand %p2443_p0, %p2437_p5 }
  0xd9   : > { %v368_v17 = vpop.trf.xlu0 }
  0xda   : > { %1872 = vmatmul.mubr.msk.bf16.vlgmr.msra.gmra.mrb[0].mxu0 %vm376_vm0, %v368_v17  ;;  %v914_v25 = vpop.trf.xlu1 }
  0xdb   : > { %947 = vmatpush1.bf16.msra.mxu0 %v323_v12  ;;  %443 = vmatprep.mubr.bf16.mxu0 %v2591_v0 }
  0xdc   : > { %948 = vmatprep.subr.bf16.mxu0 %v326_v13 }
  0xdd   : > { %v369_v18 = vpop.trf.xlu0 }
  0xde   : > { %v915_v26 = vpop.trf.xlu1 }
  0xdf   : > { %949 = vmatpush1.bf16.msra.mxu0 %v325_v16 }
  0xe1   : > { %v370_v19 = vpop.trf.xlu0 }
  0xe2   : > { %1873 = vmatmul.mubr.msk.bf16.gmra.mrb[4].mxu0 %vm376_vm0, %v369_v18  ;;  %v916_v27 = vpop.trf.xlu1 }
  0xe3   : > { %453 = vmatprep.mubr.bf16.mxu0 %v2591_v0 }
  0xe5   : > { %v371_v20 = vpop.trf.xlu0 }
  0xe6   : > { %v917_v28 = vpop.trf.xlu1 }
  0xe9   : > { %v372_v21 = vpop.trf.xlu0 }
  0xea   : > { %1874 = vmatmul.mubr.msk.bf16.gmra.mrb[8].mxu0 %vm376_vm0, %v370_v19  ;;  %v918_v29 = vpop.trf.xlu1 }
  0xeb   : > { %463 = vmatprep.mubr.bf16.mxu0 %v2591_v0 }
  0xed   : > { %v373_v22 = vpop.trf.xlu0 }
  0xee   : > { %v919_v30 = vpop.trf.xlu1 }
  0xf1   : > { %v374_v23 = vpop.trf.xlu0 }
  0xf2   : > { %1875 = vmatmul.mubr.msk.bf16.gmra.mrb[12].mxu0 %vm376_vm0, %v371_v20  ;;  %v920_v31 = vpop.trf.xlu1 }
  0xf3   : > { %473 = vmatprep.mubr.bf16.mxu0 %v2591_v0 }
  0xf5   : > { %v375_v24 = vpop.trf.xlu0 }
  0xf6   : > { %v921_v32 = vpop.trf.xlu1 }
  0xfa   : > { %1876 = vmatmul.mubr.msk.bf16.gmra.mrb[16].mxu0 %vm376_vm0, %v372_v21 }
  0xfb   : > { %483 = vmatprep.mubr.bf16.mxu0 %v2591_v0 }
 0x102   : > { %1877 = vmatmul.mubr.msk.bf16.gmra.mrb[20].mxu0 %vm376_vm0, %v373_v22 }
 0x103   : > { %493 = vmatprep.mubr.bf16.mxu0 %v2591_v0 }
 0x10a   : > { %1878 = vmatmul.mubr.msk.bf16.gmra.mrb[24].mxu0 %vm376_vm0, %v374_v23 }
 0x10b   : > { %503 = vmatprep.mubr.bf16.mxu0 %v2591_v0 }
 0x112   : > { %1879 = vmatmul.mubr.msk.bf16.gmra.mrb[28].mxu0 %vm376_vm0, %v375_v24 }
 0x113   : > { %978 = vmatprep.mubr.bf16.mxu0 %v2591_v0 }
 0x11a   : > { %1946 = vmatmul.mubr.msk.bf16.vlgmr.msra.gmra.mrb[32].mxu0 %vm376_vm0, %v914_v25 }
 0x11b   : > { %988 = vmatprep.mubr.bf16.mxu0 %v2591_v0 }
 0x122   : > { %1947 = vmatmul.mubr.msk.bf16.gmra.mrb[36].mxu0 %vm376_vm0, %v915_v26 }
 0x123   : > { %998 = vmatprep.mubr.bf16.mxu0 %v2591_v0 }
 0x12a   : > { %1948 = vmatmul.mubr.msk.bf16.gmra.mrb[40].mxu0 %vm376_vm0, %v916_v27 }
 0x12b   : > { %1008 = vmatprep.mubr.bf16.mxu0 %v2591_v0 }
 0x132   : > { %1949 = vmatmul.mubr.msk.bf16.gmra.mrb[44].mxu0 %vm376_vm0, %v917_v28 }
 0x133   : > { %1018 = vmatprep.mubr.bf16.mxu0 %v2591_v0 }
 0x13a   : > { %1950 = vmatmul.mubr.msk.bf16.gmra.mrb[48].mxu0 %vm376_vm0, %v918_v29 }
 0x13b   : > { %1028 = vmatprep.mubr.bf16.mxu0 %v2591_v0 }
 0x142   : > { %1951 = vmatmul.mubr.msk.bf16.gmra.mrb[52].mxu0 %vm376_vm0, %v919_v30  ;;  %v4157_v30 = vlaneseq }
 0x143   : > { %1038 = vmatprep.mubr.bf16.mxu0 %v2591_v0 }
 0x14a   : > { %1952 = vmatmul.mubr.msk.bf16.gmra.mrb[56].mxu0 %vm376_vm0, %v920_v31 }
 0x14b   : > { %1048 = vmatprep.mubr.bf16.mxu0 %v2591_v0 }
 0x152   : > { %1953 = vmatmul.mubr.msk.bf16.gmra.mrb[60].mxu0 %vm376_vm0, %v921_v32 }
 0x1ad   : > { %v2866_v33 = vpop.f32.mrb[0].mxu0 }
 0x1ae   : > { %v2868_v34 = vpop.f32.mrb[1].mxu0 }
 0x1af   : > { %v2870_v35 = vpop.f32.mrb[2].mxu0 }
 0x1b0   : > { %v2872_v36 = vpop.f32.mrb[3].mxu0 }
 0x1b5   : > { %v2874_v37 = vpop.f32.mrb[4].mxu0 }
 0x1b6   : > { %v514_v38 = vmax.f32 %v2866_v33, %v2874_v37  ;;  %v2878_v39 = vpop.f32.mrb[5].mxu0 }
 0x1b7   : > { %v535_v40 = vmax.f32 %v2868_v34, %v2878_v39  ;;  %v2882_v41 = vpop.f32.mrb[6].mxu0 }
 0x1b8   : > { %v515_v42 = vmax.f32 %v2870_v35, %v2882_v41  ;;  %v2886_v43 = vpop.f32.mrb[7].mxu0 }
 0x1b9   : > { %v536_v44 = vmax.f32 %v2872_v36, %v2886_v43 }
 0x1bd   : > { %v2890_v45 = vpop.f32.mrb[8].mxu0 }
 0x1be   : > { %v516_v46 = vmax.f32 %v514_v38, %v2890_v45  ;;  %v2893_v47 = vpop.f32.mrb[9].mxu0 }
 0x1bf   : > { %v537_v48 = vmax.f32 %v535_v40, %v2893_v47  ;;  %v2896_v49 = vpop.f32.mrb[10].mxu0 }
 0x1c0   : > { %v517_v50 = vmax.f32 %v515_v42, %v2896_v49  ;;  %v2899_v51 = vpop.f32.mrb[11].mxu0  ;;  %v4155_v42 = vmov 1.0  }
 0x1c1   : > { %v538_v52 = vmax.f32 %v536_v44, %v2899_v51  ;;  %882 = vmatprep.mubr.f32.mxu1 %v4155_v42  ;;  %1603 = vmatprep.mubr.f32.mxu0 %v4155_v42 }
 0x1c5   : > { %v2902_v53 = vpop.f32.mrb[12].mxu0 }
 0x1c6   : > { %v518_v54 = vmax.f32 %v516_v46, %v2902_v53  ;;  %v2905_v55 = vpop.f32.mrb[13].mxu0 }
 0x1c7   : > { %v539_v56 = vmax.f32 %v537_v48, %v2905_v55  ;;  %v2908_v57 = vpop.f32.mrb[14].mxu0  ;;  %v2969_v48 = vshrl.u32 %v4157_v30, 7 }
 0x1c8   : > { %v519_v58 = vmax.f32 %v517_v50, %v2908_v57  ;;  %v2911_v59 = vpop.f32.mrb[15].mxu0 }
 0x1c9   : > { %v540_v60 = vmax.f32 %v538_v52, %v2911_v59 }
 0x1cd   : > { %v2914_v61 = vpop.f32.mrb[16].mxu0 }
 0x1ce   : > { %v520_v62 = vmax.f32 %v518_v54, %v2914_v61  ;;  %v2917_v63 = vpop.f32.mrb[17].mxu0 }
 0x1cf   : > { %v541_v0 = vmax.f32 %v539_v56, %v2917_v63  ;;  %v2920_v1 = vpop.f32.mrb[18].mxu0 }
 0x1d0   : > { %v521_v2 = vmax.f32 %v519_v58, %v2920_v1  ;;  %v2923_v3 = vpop.f32.mrb[19].mxu0 }
 0x1d1   : > { %v542_v4 = vmax.f32 %v540_v60, %v2923_v3 }
 0x1d5   : > { %v2926_v5 = vpop.f32.mrb[20].mxu0 }
 0x1d6   : > { %v522_v6 = vmax.f32 %v520_v62, %v2926_v5  ;;  %v2929_v7 = vpop.f32.mrb[21].mxu0  ;;  %v2976_v62 = vadd.s32 8, %v2969_v48 }
 0x1d7   : > { %v543_v8 = vmax.f32 %v541_v0, %v2929_v7  ;;  %v2932_v9 = vpop.f32.mrb[22].mxu0  ;;  %v2979_v0 = vadd.s32 16, %v2969_v48 }
 0x1d8   : > { %v523_v10 = vmax.f32 %v521_v2, %v2932_v9  ;;  %v2935_v11 = vpop.f32.mrb[23].mxu0 }
 0x1d9   : > { %v544_v12 = vmax.f32 %v542_v4, %v2935_v11  ;;  %v2982_v4 = vadd.s32 24, %v2969_v48 }
 0x1dd   : > { %v2938_v13 = vpop.f32.mrb[24].mxu0 }
 0x1de   : > { %v524_v14 = vmax.f32 %v522_v6, %v2938_v13  ;;  %v2941_v15 = vpop.f32.mrb[25].mxu0  ;;  %v2985_v6 = vadd.s32 32, %v2969_v48 }
 0x1df   : > { %v545_v16 = vmax.f32 %v543_v8, %v2941_v15  ;;  %v2944_v17 = vpop.f32.mrb[26].mxu0  ;;  %v2988_v8 = vadd.s32 40, %v2969_v48 }
 0x1e0   : > { %v525_v18 = vmax.f32 %v523_v10, %v2944_v17  ;;  %v2947_v19 = vpop.f32.mrb[27].mxu0 }
 0x1e1   : > { %v546_v20 = vmax.f32 %v544_v12, %v2947_v19  ;;  %v2991_v12 = vadd.s32 48, %v2969_v48 }
 0x1e5   : > { %v2950_v21 = vpop.f32.mrb[28].mxu0 }
 0x1e6   : > { %v526_v22 = vmax.f32 %v524_v14, %v2950_v21  ;;  %v2953_v23 = vpop.f32.mrb[29].mxu0  ;;  %v2994_v14 = vadd.s32 56, %v2969_v48 }
 0x1e7   : > { %v547_v24 = vmax.f32 %v545_v16, %v2953_v23  ;;  %v2956_v25 = vpop.f32.mrb[30].mxu0  ;;  %v2997_v16 = vadd.s32 64, %v2969_v48 }
 0x1e8   : > { %v527_v26 = vmax.f32 %v525_v18, %v2956_v25  ;;  %v2959_v27 = vpop.f32.mrb[31].mxu0  ;;  %v3000_v18 = vadd.s32 72, %v2969_v48 }
 0x1e9   : > { %v548_v28 = vmax.f32 %v546_v20, %v2959_v27 }
 0x1ea   : > { %v528_v29 = vmax.f32 %v526_v22, %v527_v26  ;;  %v3005_v22 = vadd.s32 80, %v2969_v48 }
 0x1eb   : > { %v549_v31 = vmax.f32 %v547_v24, %v548_v28  ;;  %v3008_v24 = vadd.s32 88, %v2969_v48 }
 0x1ec   : > { %v529_v32 = vrot.slane %v528_v29, 4 }
 0x1ed   : > { %v550_v38 = vrot.slane %v549_v31, 4  ;;  %v2962_v40 = vpop.f32.mrb[32].mxu0 }
 0x1ee   : > { %v530_v44 = vmax.f32 %v528_v29, %v529_v32  ;;  %v2966_v46 = vpop.f32.mrb[33].mxu0  ;;  %v3020_v32 = vadd.s32 104, %v2969_v48 }
 0x1ef   : > { %v551_v50 = vmax.f32 %v549_v31, %v550_v38  ;;  %v2971_v52 = vpop.f32.mrb[34].mxu0  ;;  %v3017_v31 = vadd.s32 96, %v2969_v48 }
 0x1f0   : > { %v531_v54 = vrot.slane %v530_v44, 2  ;;  %v2973_v56 = vpop.f32.mrb[35].mxu0 }
 0x1f1   : > { %v552_v58 = vrot.slane %v551_v50, 2 }
 0x1f2   : > { %v532_v60 = vmax.f32 %v530_v44, %v531_v54 }
 0x1f3   : > { %v553_v2 = vmax.f32 %v551_v50, %v552_v58  ;;  %v3061_v58 = vadd.s32 112, %v2969_v48 }
 0x1f4   : > { %v533_v10 = vrot.slane %v532_v60, 1 }
 0x1f5   : > { %v3002_v20 = vpop.f32.mrb[36].mxu0  ;;  %v554_v38 = vrot.slane %v553_v2, 1 }
 0x1f6   : > { %v3010_v26 = vmax.f32 %v532_v60, %v533_v10  ;;  %v3014_v29 = vpop.f32.mrb[37].mxu0  ;;  %v3064_v60 = vadd.s32 120, %v2969_v48 }
 0x1f7   : > { %4193 = vst [vmem:[#allocation16_spill] sm:$0xff] %v3014_v29  ;;  %v3024_v50 = vpop.f32.mrb[38].mxu0  ;;  %v3070_v42 = vmax.f32 %v553_v2, %v554_v38 }
 0x1f8   : > { %vm556_vm1 = vcmp.ge.f32.partialorder %v2866_v33, %v3010_v26  ;;  %vm558_vm2 = vcmp.ge.f32.partialorder %v2870_v35, %v3010_v26  ;;  %vm560_vm3 = vcmp.ge.f32.partialorder %v2874_v37, %v3010_v26  ;;  %vm562_vm4 = vcmp.ge.f32.partialorder %v2882_v41, %v3010_v26  ;;  %v3034_v54 = vpop.f32.mrb[39].mxu0 }
 0x1f9   : > { %4194 = vst [vmem:[#allocation17_spill] sm:$0xff] %v3034_v54  ;;  %vm564_vm5 = vcmp.ge.f32.partialorder %v2890_v45, %v3010_v26  ;;  %vm566_vm6 = vcmp.ge.f32.partialorder %v2896_v49, %v3010_v26  ;;  %vm568_vm7 = vcmp.ge.f32.partialorder %v2902_v53, %v3010_v26  ;;  %vm570_vm8 = vcmp.ge.f32.partialorder %v2908_v57, %v3010_v26 }
 0x1fa   : > { %vm572_vm9 = vcmp.ge.f32.partialorder %v2914_v61, %v3010_v26  ;;  %vm574_vm10 = vcmp.ge.f32.partialorder %v2920_v1, %v3010_v26  ;;  %vm576_vm11 = vcmp.ge.f32.partialorder %v2926_v5, %v3010_v26  ;;  %vm578_vm12 = vcmp.ge.f32.partialorder %v2932_v9, %v3010_v26 }
 0x1fb   : > { %vm580_vm13 = vcmp.ge.f32.partialorder %v2938_v13, %v3010_v26  ;;  %vm582_vm14 = vcmp.ge.f32.partialorder %v2944_v17, %v3010_v26  ;;  %vm584_vm15 = vcmp.ge.f32.partialorder %v2950_v21, %v3010_v26  ;;  %vm586_vm0 = vcmp.ge.f32.partialorder %v2956_v25, %v3010_v26 }
 0x1fc   : > { %v588_v10 = vsel %vm556_vm1, %v2969_v48, 128  ;;  %v590_v30 = vsel %vm558_vm2, %v2976_v62, 128  ;;  %v592_v44 = vsel %vm560_vm3, %v2979_v0, 128  ;;  %v594_v28 = vsel %vm562_vm4, %v2982_v4, 128 }
 0x1fd   : > { %v596_v33 = vsel %vm564_vm5, %v2985_v6, 128  ;;  %v3088_v2 = vpop.f32.mrb[40].mxu0  ;;  %v598_v35 = vsel %vm566_vm6, %v2988_v8, 128  ;;  %v600_v37 = vsel %vm568_vm7, %v2991_v12, 128  ;;  %v602_v41 = vsel %vm570_vm8, %v2994_v14, 128 }
 0x1fe   : > { %v604_v45 = vsel %vm572_vm9, %v2997_v16, 128  ;;  %v3106_v38 = vpop.f32.mrb[41].mxu0  ;;  %v606_v49 = vsel %vm574_vm10, %v3000_v18, 128  ;;  %v608_v53 = vsel %vm576_vm11, %v3005_v22, 128  ;;  %v610_v57 = vsel %vm578_vm12, %v3008_v24, 128 }
 0x1ff   : > { %4195 = vst [vmem:[#allocation18_spill] sm:$0xff] %v3106_v38  ;;  %v612_v61 = vsel %vm580_vm13, %v3017_v31, 128  ;;  %v3124_v29 = vpop.f32.mrb[42].mxu0  ;;  %vm620_vm1 = vcmp.lt.s32.totalorder %v588_v10, %v592_v44  ;;  %vm622_vm2 = vcmp.lt.s32.totalorder %v590_v30, %v594_v28  ;;  %vm557_vm3 = vcmp.ge.f32.partialorder %v2868_v34, %v3070_v42 }
 0x200   : > { %4196 = vst [vmem:[#allocation19_spill] sm:$0xff] %v3124_v29  ;;  %vm559_vm4 = vcmp.ge.f32.partialorder %v2872_v36, %v3070_v42  ;;  %v3130_v1 = vpop.f32.mrb[43].mxu0  ;;  %v621_v5 = vsel %vm620_vm1, %v588_v10, %v592_v44  ;;  %v623_v9 = vsel %vm622_vm2, %v590_v30, %v594_v28  ;;  %vm561_vm5 = vcmp.ge.f32.partialorder %v2878_v39, %v3070_v42 }
 0x201   : > { %vm624_vm7 = vcmp.lt.s32.totalorder %v621_v5, %v596_v33  ;;  %vm626_vm8 = vcmp.lt.s32.totalorder %v623_v9, %v598_v35  ;;  %vm565_vm9 = vcmp.ge.f32.partialorder %v2893_v47, %v3070_v42  ;;  %vm575_vm6 = vcmp.ge.f32.partialorder %v2923_v3, %v3070_v42 }
 0x202   : > { %v625_v13 = vsel %vm624_vm7, %v621_v5, %v596_v33  ;;  %v627_v29 = vsel %vm626_vm8, %v623_v9, %v598_v35  ;;  %vm577_vm7 = vcmp.ge.f32.partialorder %v2929_v7, %v3070_v42  ;;  %vm579_vm8 = vcmp.ge.f32.partialorder %v2935_v11, %v3070_v42 }
 0x203   : > { %vm628_vm13 = vcmp.lt.s32.totalorder %v625_v13, %v600_v37  ;;  %vm630_vm1 = vcmp.lt.s32.totalorder %v627_v29, %v602_v41  ;;  %vm581_vm10 = vcmp.ge.f32.partialorder %v2941_v15, %v3070_v42  ;;  %vm583_vm2 = vcmp.ge.f32.partialorder %v2947_v19, %v3070_v42 }
 0x204   : > { %v629_v30 = vsel %vm628_vm13, %v625_v13, %v600_v37  ;;  %v631_v28 = vsel %vm630_vm1, %v627_v29, %v602_v41  ;;  %vm585_vm13 = vcmp.ge.f32.partialorder %v2953_v23, %v3070_v42  ;;  %v614_v37 = vsel %vm582_vm14, %v3020_v32, 128 }
 0x205   : > { %v3152_v44 = vpop.f32.mrb[44].mxu0  ;;  %vm632_vm11 = vcmp.lt.s32.totalorder %v629_v30, %v604_v45  ;;  %vm634_vm12 = vcmp.lt.s32.totalorder %v631_v28, %v606_v49  ;;  %v616_v41 = vsel %vm584_vm15, %v3061_v58, 128  ;;  %v589_v17 = vsel %vm557_vm3, %v2969_v48, 128 }
 0x206   : > { %v3158_v10 = vpop.f32.mrb[45].mxu0  ;;  %v633_v33 = vsel %vm632_vm11, %v629_v30, %v604_v45  ;;  %v635_v29 = vsel %vm634_vm12, %v631_v28, %v606_v49  ;;  %v618_v49 = vsel %vm586_vm0, %v3064_v60, 128  ;;  %v591_v21 = vsel %vm559_vm4, %v2976_v62, 128 }
 0x207   : > { %v3164_v35 = vpop.f32.mrb[46].mxu0  ;;  %vm636_vm11 = vcmp.lt.s32.totalorder %v633_v33, %v608_v53  ;;  %vm638_vm12 = vcmp.lt.s32.totalorder %v635_v29, %v610_v57  ;;  %v593_v25 = vsel %vm561_vm5, %v2979_v0, 128  ;;  %vm4197_vm15 = vcmp.ge.f32.partialorder %v2886_v43, %v3070_v42 }
 0x208   : > { %v3174_v45 = vpop.f32.mrb[47].mxu0  ;;  %v637_v5 = vsel %vm636_vm11, %v633_v33, %v608_v53  ;;  %v639_v9 = vsel %vm638_vm12, %v635_v29, %v610_v57  ;;  %v595_v34 = vsel %vm4197_vm15, %v2982_v4, 128  ;;  %v597_v57 = vsel %vm565_vm9, %v2985_v6, 128 }
 0x209   : > { %vm640_vm14 = vcmp.lt.s32.totalorder %v637_v5, %v612_v61  ;;  %vm642_vm1 = vcmp.lt.s32.totalorder %v639_v9, %v614_v37  ;;  %vm4198_vm4 = vcmp.ge.f32.partialorder %v2899_v51, %v3070_v42  ;;  %vm4199_vm5 = vcmp.ge.f32.partialorder %v2905_v55, %v3070_v42 }
 0x20a   : > { %v641_v26 = vsel %vm640_vm14, %v637_v5, %v612_v61  ;;  %v643_v53 = vsel %vm642_vm1, %v639_v9, %v614_v37  ;;  %v599_v36 = vsel %vm4198_vm4, %v2988_v8, 128  ;;  %v601_v39 = vsel %vm4199_vm5, %v2991_v12, 128 }
 0x20b   : > { %vm644_vm0 = vcmp.lt.s32.totalorder %v641_v26, %v616_v41  ;;  %vm646_vm3 = vcmp.lt.s32.totalorder %v643_v53, %v618_v49  ;;  %vm4200_vm1 = vcmp.ge.f32.partialorder %v2911_v59, %v3070_v42  ;;  %vm4201_vm9 = vcmp.ge.f32.partialorder %v2917_v63, %v3070_v42 }
 0x20c   : > { %v645_v61 = vsel %vm644_vm0, %v641_v26, %v616_v41  ;;  %v647_v43 = vsel %vm646_vm3, %v643_v53, %v618_v49  ;;  %v603_v47 = vsel %vm4200_vm1, %v2994_v14, 128  ;;  %v605_v13 = vsel %vm4201_vm9, %v2997_v16, 128 }
 0x20d   : > { %v3216_v30 = vpop.f32.mrb[48].mxu0  ;;  %vm648_vm11 = vcmp.lt.s32.totalorder %v645_v61, %v647_v43  ;;  %v607_v51 = vsel %vm575_vm6, %v3000_v18, 128  ;;  %v609_v55 = vsel %vm577_vm7, %v3005_v22, 128  ;;  %v611_v59 = vsel %vm579_vm8, %v3008_v24, 128 }
 0x20e   : > { %v3230_v63 = vpop.f32.mrb[49].mxu0  ;;  %v649_v28 = vsel %vm648_vm11, %v645_v61, %v647_v43  ;;  %v613_v33 = vsel %vm581_vm10, %v3017_v31, 128  ;;  %vm659_vm12 = vcmp.lt.s32.totalorder %v589_v17, %v593_v25  ;;  %vm661_vm6 = vcmp.lt.s32.totalorder %v591_v21, %v595_v34 }
 0x20f   : > { %v3236_v3 = vpop.f32.mrb[50].mxu0  ;;  %v650_v29 = vrot.slane %v649_v28, 4  ;;  %v660_v7 = vsel %vm659_vm12, %v589_v17, %v593_v25  ;;  %v662_v37 = vsel %vm661_vm6, %v591_v21, %v595_v34  ;;  %v1060_v41 = vmax.f32 %v2971_v52, %v3024_v50  ;;  %v4203_v17 = vld [vmem:[#allocation16_spill] sm:$0xff]  ;;  %v4205_v34 = vld [vmem:[#allocation19_spill] sm:$0xff] }
 0x210   : > { %v3240_v11 = vpop.f32.mrb[51].mxu0  ;;  %vm663_vm7 = vcmp.lt.s32.totalorder %v660_v7, %v597_v57  ;;  %vm665_vm8 = vcmp.lt.s32.totalorder %v662_v37, %v599_v36  ;;  %v1081_v49 = vmax.f32 %v2973_v56, %v3034_v54  ;;  %v4202_v15 = vmax.f32 %v2962_v40, %v3002_v20 }
 0x211   : > { %vm651_vm10 = vcmp.lt.s32.totalorder %v649_v28, %v650_v29  ;;  %v664_v9 = vsel %vm663_vm7, %v660_v7, %v597_v57  ;;  %v666_v26 = vsel %vm665_vm8, %v662_v37, %v599_v36  ;;  %v4204_v21 = vmax.f32 %v2966_v46, %v4203_v17 }
 0x212   : > { %v1061_v5 = vmax.f32 %v4202_v15, %v3088_v2  ;;  %v652_v53 = vsel %vm651_vm10, %v649_v28, %v650_v29  ;;  %vm667_vm14 = vcmp.lt.s32.totalorder %v664_v9, %v601_v39  ;;  %vm669_vm15 = vcmp.lt.s32.totalorder %v666_v26, %v603_v47 }
 0x213   : > { %v1082_v25 = vmax.f32 %v4204_v21, %v3106_v38  ;;  %v1062_v61 = vmax.f32 %v1060_v41, %v4205_v34  ;;  %v615_v43 = vsel %vm583_vm2, %v3020_v32, 128  ;;  %v668_v54 = vsel %vm667_vm14, %v664_v9, %v601_v39 }
 0x214   : > { %v670_v15 = vsel %vm669_vm15, %v666_v26, %v603_v47  ;;  %v1083_v57 = vmax.f32 %v1081_v49, %v3130_v1  ;;  %vm671_vm0 = vcmp.lt.s32.totalorder %v668_v54, %v605_v13  ;;  %v1063_v36 = vmax.f32 %v1061_v5, %v3152_v44 }
 0x215   : > { %vm673_vm3 = vcmp.lt.s32.totalorder %v670_v15, %v607_v51  ;;  %v1084_v7 = vmax.f32 %v1082_v25, %v3158_v10  ;;  %v3260_v28 = vpop.f32.mrb[52].mxu0  ;;  %v653_v29 = vrot.slane %v652_v53, 2  ;;  %v672_v37 = vsel %vm671_vm0, %v668_v54, %v605_v13 }
 0x216   : > { %v674_v41 = vsel %vm673_vm3, %v670_v15, %v607_v51  ;;  %v1064_v21 = vmax.f32 %v1062_v61, %v3164_v35  ;;  %v3263_v38 = vpop.f32.mrb[53].mxu0  ;;  %v617_v19 = vsel %vm585_vm13, %v3061_v58, 128  ;;  %vm675_vm2 = vcmp.lt.s32.totalorder %v672_v37, %v609_v55 }
 0x217   : > { %vm677_vm4 = vcmp.lt.s32.totalorder %v674_v41, %v611_v59  ;;  %v1085_v39 = vmax.f32 %v1083_v57, %v3174_v45  ;;  %v3270_v47 = vpop.f32.mrb[54].mxu0  ;;  %vm4206_vm5 = vcmp.ge.f32.partialorder %v2959_v27, %v3070_v42  ;;  %v676_v13 = vsel %vm675_vm2, %v672_v37, %v609_v55 }
 0x218   : > { %v619_v54 = vsel %vm4206_vm5, %v3064_v60, 128  ;;  %v678_v51 = vsel %vm677_vm4, %v674_v41, %v611_v59  ;;  %v1065_v49 = vmax.f32 %v1063_v36, %v3216_v30  ;;  %v3277_v5 = vpop.f32.mrb[55].mxu0  ;;  %vm679_vm1 = vcmp.lt.s32.totalorder %v676_v13, %v613_v33 }
 0x219   : > { %vm681_vm9 = vcmp.lt.s32.totalorder %v678_v51, %v615_v43  ;;  %v1086_v23 = vmax.f32 %v1084_v7, %v3230_v63  ;;  %v1066_v9 = vmax.f32 %v1064_v21, %v3236_v3  ;;  %vm654_vm13 = vcmp.lt.s32.totalorder %v652_v53, %v653_v29 }
 0x21a   : > { %v680_v26 = vsel %vm679_vm1, %v676_v13, %v613_v33  ;;  %v682_v25 = vsel %vm681_vm9, %v678_v51, %v615_v43  ;;  %v1087_v61 = vmax.f32 %v1085_v39, %v3240_v11  ;;  %v1067_v27 = vmax.f32 %v1065_v49, %v3260_v28 }
 0x21b   : > { %vm683_vm11 = vcmp.lt.s32.totalorder %v680_v26, %v617_v19  ;;  %vm685_vm12 = vcmp.lt.s32.totalorder %v682_v25, %v619_v54  ;;  %v1088_v59 = vmax.f32 %v1086_v23, %v3263_v38  ;;  %v1068_v15 = vmax.f32 %v1066_v9, %v3270_v47 }
 0x21c   : > { %v684_v42 = vsel %vm683_vm11, %v680_v26, %v617_v19  ;;  %v686_v55 = vsel %vm685_vm12, %v682_v25, %v619_v54  ;;  %v655_v57 = vsel %vm654_vm13, %v652_v53, %v653_v29  ;;  %v1089_v36 = vmax.f32 %v1087_v61, %v3277_v5 }
 0x21d   : > { %vm687_vm6 = vcmp.lt.s32.totalorder %v684_v42, %v686_v55  ;;  %v3286_v7 = vpop.f32.mrb[56].mxu0  ;;  %v656_v39 = vrot.slane %v655_v57, 1  ;;  %v2593_v23 = vmov 1966171168  }
 0x21e   : > { %v688_v33 = vsel %vm687_vm6, %v684_v42, %v686_v55  ;;  %v1069_v43 = vmax.f32 %v1067_v27, %v3286_v7  ;;  %v3289_v37 = vpop.f32.mrb[57].mxu0  ;;  %v800_v9 = vunpack.c.l.s4 %v2593_v23 }
 0x21f   : > { %v689_v41 = vrot.slane %v688_v33, 4  ;;  %v1090_v21 = vmax.f32 %v1088_v59, %v3289_v37  ;;  %v3292_v19 = vpop.f32.mrb[58].mxu0  ;;  %vm657_vm8 = vcmp.lt.s32.totalorder %v655_v57, %v656_v39 }
 0x220   : > { %v1070_v54 = vmax.f32 %v1068_v15, %v3292_v19  ;;  %v3295_v13 = vpop.f32.mrb[59].mxu0  ;;  %v3303_v27 = vsel %vm657_vm8, %v655_v57, %v656_v39 }
 0x221   : > { %vm690_vm7 = vcmp.lt.s32.totalorder %v688_v33, %v689_v41  ;;  %v1091_v53 = vmax.f32 %v1089_v36, %v3295_v13  ;;  %vm698_vm15 = vcmp.eq.s32.totalorder %v2969_v48, %v3303_v27  ;;  %vm700_vm0 = vcmp.eq.s32.totalorder %v2976_v62, %v3303_v27 }
 0x222   : > { %v691_v29 = vsel %vm690_vm7, %v688_v33, %v689_v41  ;;  %v801_v41 = vunpack.c.0.s8 %v800_v9  ;;  %vm3333_vm9 = vmpackc.low %vm700_vm0, %vm698_vm15  ;;  %vm702_vm11 = vcmp.eq.s32.totalorder %v2979_v0, %v3303_v27  ;;  %vm704_vm12 = vcmp.eq.s32.totalorder %v2982_v4, %v3303_v27 }
 0x223   : > { %v692_v51 = vrot.slane %v691_v29, 2 }
 0x225   : > { %vm693_vm10 = vcmp.lt.s32.totalorder %v691_v29, %v692_v51  ;;  %v3298_v49 = vpop.f32.mrb[60].mxu0 }
 0x226   : > { %v694_v26 = vsel %vm693_vm10, %v691_v29, %v692_v51  ;;  %v1071_v25 = vmax.f32 %v1069_v43, %v3298_v49  ;;  %v3301_v61 = vpop.f32.mrb[61].mxu0  ;;  %vm3368_vm10 = vmpackc.low %vm704_vm12, %vm702_vm11  ;;  %v1342_v43 = vld [vmem:[#allocation7 + $0x30] sm:$0xff] }
 0x227   : > { %v695_v42 = vrot.slane %v694_v26, 1  ;;  %v1092_v55 = vmax.f32 %v1090_v21, %v3301_v61  ;;  %v3306_v59 = vpop.f32.mrb[62].mxu0 }
 0x228   : > { %v1072_v15 = vmax.f32 %v1070_v54, %v3306_v59  ;;  %v3309_v36 = vpop.f32.mrb[63].mxu0  ;;  %v4165_v54 = vmov 1.0|1.0  }
 0x229   : > { %vm696_vm14 = vcmp.lt.s32.totalorder %v694_v26, %v695_v42  ;;  %v1093_v33 = vmax.f32 %v1091_v53, %v3309_v36 }
 0x22a   : > { %v3312_v29 = vsel %vm696_vm14, %v694_v26, %v695_v42  ;;  %v1073_v57 = vmax.f32 %v1071_v25, %v1072_v15  ;;  %v3345_v26 = vsub.s32 %v801_v41, %v2969_v48 }
 0x22b   : > { %vm699_vm3 = vcmp.eq.s32.totalorder %v2969_v48, %v3312_v29  ;;  %vm701_vm2 = vcmp.eq.s32.totalorder %v2976_v62, %v3312_v29  ;;  %vm703_vm4 = vcmp.eq.s32.totalorder %v2979_v0, %v3312_v29  ;;  %vm705_vm5 = vcmp.eq.s32.totalorder %v2982_v4, %v3312_v29 }
 0x22c   : > { %vm3326_vm1 = vmpackc.low %vm701_vm2, %vm699_vm3  ;;  %v1074_v21 = vrot.slane %v1073_v57, 4  ;;  %v1094_v39 = vmax.f32 %v1092_v55, %v1093_v33  ;;  %v798_v55 = vcombine.low %v3303_v27, %v3312_v29  ;;  %vm707_vm6 = vcmp.eq.s32.totalorder %v2985_v6, %v3312_v29 }
 0x22d   : > { %2100 = vmatprep.subr.msk.bf16.mxu1 %vm3326_vm1, %v4165_v54  ;;  %vm3340_vm13 = vmpackc.low %vm705_vm5, %vm703_vm4  ;;  %vm709_vm7 = vcmp.eq.s32.totalorder %v2988_v8, %v3312_v29  ;;  %vm4223_vm3 = vcmp.eq.s32.totalorder %v2985_v6, %v3303_v27 }
 0x22e   : > { %2102 = vmatpush1.bf16.xpose.msk.msra.mxu1 %vm3333_vm9, %v4165_v54  ;;  %v1075_v23 = vmax.f32 %v1073_v57, %v1074_v21  ;;  %v1095_v9 = vrot.slane %v1094_v39, 4  ;;  %v805_v33 = vrot.slane %v798_v55, %v3345_v26  ;;  %v4213_v57 = vlaneseq  ;;  %vm3375_vm14 = vmpackc.low %vm709_vm7, %vm707_vm6  ;;  %v794_v21 = vld [vmem:[#allocation7] sm:$0xff] }
 0x22f   : > { %2104 = vmatprep.subr.msk.bf16.mxu1 %vm3340_vm13, %v4165_v54 }
 0x230   : > { %v1076_v25 = vrot.slane %v1075_v23, 2  ;;  %v1096_v42 = vmax.f32 %v1094_v39, %v1095_v9  ;;  %vm3363_vm8 = vcmp.lt.s32.totalorder %v4213_v57, 256  ;;  %v812_v9 = vrot.slane %v805_v33, %v3345_v26 }
 0x232   : > { %v1077_v15 = vmax.f32 %v1075_v23, %v1076_v25  ;;  %v1097_v41 = vrot.slane %v1096_v42, 2  ;;  %v4218_v23 = vmov 1.0|1.0   ;;  %v4219_v25 = vmov 0  ;;  %817 = vst.msk [vmem:[%s3383_s28] sm:$0x3] %vm3363_vm8, %v812_v9 }
 0x233   : > { %v4220_v25 = vsel %vm3375_vm14, 4294967295, %v4219_v25 }
 0x234   : > { %v1078_v39 = vrot.slane %v1077_v15, 1  ;;  %4221 = vst [vmem:[#allocation16_spill] sm:$0xff] %v4220_v25  ;;  %v1098_v33 = vmax.f32 %v1096_v42, %v1097_v41 }
 0x236   : > { %2106 = vmatpush1.bf16.xpose.msk.msra.mxu1 %vm3368_vm10, %v4218_v23  ;;  %v3379_v55 = vmax.f32 %v1077_v15, %v1078_v39  ;;  %v1099_v42 = vrot.slane %v1098_v33, 1 }
 0x237   : > { %2108 = vmatprep.subr.msk.bf16.mxu1 %vm3375_vm14, %v4218_v23 }
 0x238   : > { %vm1101_vm4 = vcmp.ge.f32.partialorder %v2962_v40, %v3379_v55  ;;  %vm1103_vm5 = vcmp.ge.f32.partialorder %v2971_v52, %v3379_v55  ;;  %vm1105_vm11 = vcmp.ge.f32.partialorder %v3002_v20, %v3379_v55  ;;  %vm1125_vm7 = vcmp.ge.f32.partialorder %v3286_v7, %v3379_v55 }
 0x239   : > { %vm1127_vm2 = vcmp.ge.f32.partialorder %v3292_v19, %v3379_v55  ;;  %v1133_v15 = vsel %vm1101_vm4, %v2969_v48, 128  ;;  %v1135_v41 = vsel %vm1103_vm5, %v2976_v62, 128  ;;  %v1137_v57 = vsel %vm1105_vm11, %v2979_v0, 128  ;;  %v4241_v19 = vld [vmem:[#allocation17_spill] sm:$0xff] }
 0x23a   : > { %vm4222_vm0 = vcmp.ge.f32.partialorder %v3024_v50, %v3379_v55  ;;  %vm4224_vm4 = vcmp.eq.s32.totalorder %v2988_v8, %v3303_v27  ;;  %v4225_v40 = vmov 0  ;;  %vm4228_vm5 = vcmp.ge.f32.partialorder %v3088_v2, %v3379_v55 }
 0x23b   : > { %v1139_v39 = vsel %vm4222_vm0, %v2982_v4, 128  ;;  %vm3457_vm6 = vmpackc.low %vm4224_vm4, %vm4223_vm3  ;;  %v1141_v52 = vsel %vm4228_vm5, %v2985_v6, 128  ;;  %vm4229_vm11 = vcmp.ge.f32.partialorder %v4205_v34, %v3379_v55  ;;  %vm4230_vm0 = vcmp.ge.f32.partialorder %v3152_v44, %v3379_v55  ;;  %v4313_v53 = vld [vmem:[#allocation16_spill] sm:$0xff] }
 0x23c   : > { %v4226_v40 = vsel %vm3457_vm6, 4294967295, %v4225_v40  ;;  %v1143_v20 = vsel %vm4229_vm11, %v2988_v8, 128  ;;  %v1145_v50 = vsel %vm4230_vm0, %v2991_v12, 128  ;;  %vm4231_vm3 = vcmp.eq.s32.totalorder %v2991_v12, %v3312_v29 }
 0x23d   : > { %4227 = vst [vmem:[#allocation19_spill] sm:$0xff] %v4226_v40  ;;  %vm4232_vm4 = vcmp.eq.s32.totalorder %v2994_v14, %v3312_v29  ;;  %v4233_v2 = vmov 0  ;;  %vm4236_vm0 = vcmp.ge.f32.partialorder %v3164_v35, %v3379_v55  ;;  %vm4237_vm12 = vcmp.ge.f32.partialorder %v3216_v30, %v3379_v55 }
 0x23e   : > { %2110 = vmatpush1.bf16.xpose.msk.msra.mxu1 %vm3457_vm6, %v4218_v23  ;;  %vm3482_vm5 = vmpackc.low %vm4232_vm4, %vm4231_vm3  ;;  %v1147_v44 = vsel %vm4236_vm0, %v2994_v14, 128  ;;  %v1149_v34 = vsel %vm4237_vm12, %v2997_v16, 128  ;;  %vm4238_vm3 = vcmp.ge.f32.partialorder %v3236_v3, %v3379_v55  ;;  %vm4239_vm4 = vcmp.ge.f32.partialorder %v3260_v28, %v3379_v55 }
 0x23f   : > { %v4234_v2 = vsel %vm3482_vm5, 4294967295, %v4233_v2  ;;  %v1151_v9 = vsel %vm4238_vm3, %v3000_v18, 128  ;;  %v1153_v40 = vsel %vm4239_vm4, %v3005_v22, 128  ;;  %2112 = vmatprep.subr.msk.bf16.mxu1 %vm3482_vm5, %v4218_v23  ;;  %vm4240_vm0 = vcmp.ge.f32.partialorder %v3270_v47, %v3379_v55 }
 0x240   : > { %4235 = vst [vmem:[#allocation20_spill] sm:$0xff] %v4234_v2  ;;  %v1155_v35 = vsel %vm4240_vm0, %v3008_v24, 128  ;;  %vm1165_vm12 = vcmp.lt.s32.totalorder %v1133_v15, %v1137_v57  ;;  %vm1167_vm11 = vcmp.lt.s32.totalorder %v1135_v41, %v1139_v39  ;;  %v3511_v30 = vmax.f32 %v1098_v33, %v1099_v42  ;;  %v4242_v33 = vld [vmem:[#allocation18_spill] sm:$0xff] }
 0x241   : > { %v1157_v3 = vsel %vm1125_vm7, %v3017_v31, 128  ;;  %v1159_v28 = vsel %vm1127_vm2, %v3020_v32, 128  ;;  %v1166_v2 = vsel %vm1165_vm12, %v1133_v15, %v1137_v57  ;;  %v1168_v25 = vsel %vm1167_vm11, %v1135_v41, %v1139_v39 }
 0x242   : > { %vm1169_vm3 = vcmp.lt.s32.totalorder %v1166_v2, %v1141_v52  ;;  %vm1171_vm4 = vcmp.lt.s32.totalorder %v1168_v25, %v1143_v20  ;;  %vm4243_vm7 = vcmp.eq.s32.totalorder %v2991_v12, %v3303_v27  ;;  %vm4244_vm11 = vcmp.eq.s32.totalorder %v2994_v14, %v3303_v27 }
 0x243   : > { %v1170_v47 = vsel %vm1169_vm3, %v1166_v2, %v1141_v52  ;;  %v1172_v7 = vsel %vm1171_vm4, %v1168_v25, %v1143_v20  ;;  %vm3547_vm5 = vmpackc.low %vm4244_vm11, %vm4243_vm7  ;;  %v4245_v25 = vmov 0  ;;  %vm4247_vm4 = vcmp.eq.s32.totalorder %v2997_v16, %v3312_v29 }
 0x244   : > { %vm1173_vm12 = vcmp.lt.s32.totalorder %v1170_v47, %v1145_v50  ;;  %vm1175_vm6 = vcmp.lt.s32.totalorder %v1172_v7, %v1147_v44  ;;  %v4246_v25 = vsel %vm3547_vm5, 4294967295, %v4245_v25  ;;  %vm4248_vm7 = vcmp.eq.s32.totalorder %v3000_v18, %v3312_v29  ;;  %v4315_v51 = vld [vmem:[#allocation19_spill] sm:$0xff] }
 0x245   : > { %v1174_v42 = vsel %vm1173_vm12, %v1170_v47, %v1145_v50  ;;  %v1176_v15 = vsel %vm1175_vm6, %v1172_v7, %v1147_v44  ;;  %vm3564_vm11 = vmpackc.low %vm4248_vm7, %vm4247_vm4  ;;  %v4249_v41 = vmov 0  ;;  %vm4251_vm7 = vcmp.ge.f32.partialorder %v3298_v49, %v3379_v55 }
 0x246   : > { %vm1177_vm0 = vcmp.lt.s32.totalorder %v1174_v42, %v1149_v34  ;;  %vm1179_vm15 = vcmp.lt.s32.totalorder %v1176_v15, %v1151_v9  ;;  %2114 = vmatpush1.bf16.xpose.msk.msra.mxu1 %vm3547_vm5, %v4218_v23  ;;  %v4250_v41 = vsel %vm3564_vm11, 4294967295, %v4249_v41  ;;  %vm721_vm5 = vcmp.eq.s32.totalorder %v3008_v24, %v3312_v29 }
 0x247   : > { %v1178_v57 = vsel %vm1177_vm0, %v1174_v42, %v1149_v34  ;;  %v1180_v39 = vsel %vm1179_vm15, %v1176_v15, %v1151_v9  ;;  %2116 = vmatprep.subr.msk.bf16.mxu1 %vm3564_vm11, %v4218_v23  ;;  %vm719_vm11 = vcmp.eq.s32.totalorder %v3005_v22, %v3312_v29  ;;  %vm4253_vm15 = vcmp.ge.f32.partialorder %v2966_v46, %v3511_v30  ;;  %v4317_v54 = vld [vmem:[#allocation20_spill] sm:$0xff] }
 0x248   : > { %vm1181_vm3 = vcmp.lt.s32.totalorder %v1178_v57, %v1153_v40  ;;  %vm1183_vm2 = vcmp.lt.s32.totalorder %v1180_v39, %v1155_v35  ;;  %vm4255_vm4 = vcmp.eq.s32.totalorder %v2997_v16, %v3303_v27 }
 0x249   : > { %v1182_v52 = vsel %vm1181_vm3, %v1178_v57, %v1153_v40  ;;  %v1184_v20 = vsel %vm1183_vm2, %v1180_v39, %v1155_v35  ;;  %v1161_v40 = vsel %vm4251_vm7, %v3061_v58, 128  ;;  %vm4252_vm2 = vcmp.ge.f32.partialorder %v3306_v59, %v3379_v55 }
 0x24a   : > { %vm1185_vm12 = vcmp.lt.s32.totalorder %v1182_v52, %v1157_v3  ;;  %vm1187_vm6 = vcmp.lt.s32.totalorder %v1184_v20, %v1159_v28  ;;  %v1163_v50 = vsel %vm4252_vm2, %v3064_v60, 128  ;;  %v1134_v35 = vsel %vm4253_vm15, %v2969_v48, 128 }
 0x24b   : > { %v1186_v2 = vsel %vm1185_vm12, %v1182_v52, %v1157_v3  ;;  %v1188_v44 = vsel %vm1187_vm6, %v1184_v20, %v1159_v28  ;;  %vm4254_vm7 = vcmp.ge.f32.partialorder %v4203_v17, %v3511_v30  ;;  %vm4256_vm6 = vcmp.eq.s32.totalorder %v3000_v18, %v3303_v27 }
 0x24c   : > { %vm1189_vm3 = vcmp.lt.s32.totalorder %v1186_v2, %v1161_v40  ;;  %vm1191_vm0 = vcmp.lt.s32.totalorder %v1188_v44, %v1163_v50  ;;  %v1138_v49 = vsel %vm4254_vm7, %v2979_v0, 128  ;;  %vm3609_vm12 = vmpackc.low %vm4256_vm6, %vm4255_vm4  ;;  %v4257_v59 = vmov 0 }
 0x24d   : > { %v1190_v34 = vsel %vm1189_vm3, %v1186_v2, %v1161_v40  ;;  %v1192_v9 = vsel %vm1191_vm0, %v1188_v44, %v1163_v50  ;;  %v4258_v59 = vsel %vm3609_vm12, 4294967295, %v4257_v59  ;;  %vm4259_vm15 = vcmp.ge.f32.partialorder %v2973_v56, %v3511_v30  ;;  %vm3630_vm4 = vmpackc.low %vm721_vm5, %vm719_vm11 }
 0x24e   : > { %vm1193_vm0 = vcmp.lt.s32.totalorder %v1190_v34, %v1192_v9  ;;  %v1136_v46 = vsel %vm4259_vm15, %v2976_v62, 128  ;;  %vm4260_vm2 = vcmp.ge.f32.partialorder %v4241_v19, %v3511_v30  ;;  %2118 = vmatpush1.bf16.xpose.msk.msra.mxu1 %vm3609_vm12, %v4218_v23  ;;  %v4261_v55 = vmov 0 }
 0x24f   : > { %v1140_v17 = vsel %vm4260_vm2, %v2982_v4, 128  ;;  %v4262_v55 = vsel %vm3630_vm4, 4294967295, %v4261_v55  ;;  %v1194_v56 = vsel %vm1193_vm0, %v1190_v34, %v1192_v9  ;;  %2120 = vmatprep.subr.msk.bf16.mxu1 %vm3630_vm4, %v4218_v23  ;;  %vm1204_vm3 = vcmp.lt.s32.totalorder %v1134_v35, %v1138_v49 }
 0x250   : > { %v1195_v3 = vrot.slane %v1194_v56, 4  ;;  %vm4263_vm5 = vcmp.ge.f32.partialorder %v4242_v33, %v3511_v30  ;;  %v1205_v47 = vsel %vm1204_vm3, %v1134_v35, %v1138_v49  ;;  %vm1206_vm11 = vcmp.lt.s32.totalorder %v1136_v46, %v1140_v17 }
 0x251   : > { %v1142_v28 = vsel %vm4263_vm5, %v2985_v6, 128  ;;  %vm4264_vm2 = vcmp.ge.f32.partialorder %v3130_v1, %v3511_v30  ;;  %v1207_v19 = vsel %vm1206_vm11, %v1136_v46, %v1140_v17  ;;  %vm4265_vm6 = vcmp.ge.f32.partialorder %v3158_v10, %v3511_v30 }
 0x252   : > { %vm1196_vm15 = vcmp.lt.s32.totalorder %v1194_v56, %v1195_v3  ;;  %v1144_v7 = vsel %vm4264_vm2, %v2988_v8, 128  ;;  %vm1208_vm7 = vcmp.lt.s32.totalorder %v1205_v47, %v1142_v28  ;;  %v1146_v42 = vsel %vm4265_vm6, %v2991_v12, 128 }
 0x253   : > { %v1209_v33 = vsel %vm1208_vm7, %v1205_v47, %v1142_v28  ;;  %vm1210_vm5 = vcmp.lt.s32.totalorder %v1207_v19, %v1144_v7  ;;  %vm725_vm3 = vcmp.eq.s32.totalorder %v3020_v32, %v3312_v29  ;;  %vm4266_vm0 = vcmp.ge.f32.partialorder %v3174_v45, %v3511_v30 }
 0x254   : > { %v1148_v15 = vsel %vm4266_vm0, %v2994_v14, 128  ;;  %v1211_v57 = vsel %vm1210_vm5, %v1207_v19, %v1144_v7  ;;  %vm1212_vm4 = vcmp.lt.s32.totalorder %v1209_v33, %v1146_v42  ;;  %v1197_v1 = vsel %vm1196_vm15, %v1194_v56, %v1195_v3 }
 0x255   : > { %vm4267_vm11 = vcmp.ge.f32.partialorder %v3230_v63, %v3511_v30  ;;  %v1213_v10 = vsel %vm1212_vm4, %v1209_v33, %v1146_v42  ;;  %vm1214_vm6 = vcmp.lt.s32.totalorder %v1211_v57, %v1148_v15  ;;  %vm4268_vm7 = vcmp.eq.s32.totalorder %v3005_v22, %v3303_v27 }
 0x256   : > { %v1150_v39 = vsel %vm4267_vm11, %v2997_v16, 128  ;;  %vm4269_vm2 = vcmp.eq.s32.totalorder %v3008_v24, %v3303_v27  ;;  %v4270_v52 = vmov 0  ;;  %vm4272_vm0 = vcmp.ge.f32.partialorder %v3240_v11, %v3511_v30 }
 0x257   : > { %vm3671_vm12 = vmpackc.low %vm4269_vm2, %vm4268_vm7  ;;  %v1152_v45 = vsel %vm4272_vm0, %v3000_v18, 128  ;;  %v1215_v20 = vsel %vm1214_vm6, %v1211_v57, %v1148_v15  ;;  %vm1216_vm15 = vcmp.lt.s32.totalorder %v1213_v10, %v1150_v39  ;;  %vm4273_vm4 = vcmp.eq.s32.totalorder %v3017_v31, %v3312_v29 }
 0x258   : > { %v4271_v52 = vsel %vm3671_vm12, 4294967295, %v4270_v52  ;;  %2122 = vmatpush1.bf16.xpose.msk.msra.mxu1 %vm3671_vm12, %v4218_v23  ;;  %vm3685_vm5 = vmpackc.low %vm725_vm3, %vm4273_vm4  ;;  %v4274_v63 = vmov 0  ;;  %vm4276_vm11 = vcmp.ge.f32.partialorder %v3263_v38, %v3511_v30  ;;  %v1217_v11 = vsel %vm1216_vm15, %v1213_v10, %v1150_v39 }
 0x259   : > { %v4275_v63 = vsel %vm3685_vm5, 4294967295, %v4274_v63  ;;  %v1154_v40 = vsel %vm4276_vm11, %v3005_v22, 128  ;;  %vm1218_vm7 = vcmp.lt.s32.totalorder %v1215_v20, %v1152_v45  ;;  %2124 = vmatprep.subr.msk.bf16.mxu1 %vm3685_vm5, %v4218_v23  ;;  %v1198_v50 = vrot.slane %v1197_v1, 2 }
 0x25a   : > { %vm4277_vm3 = vcmp.ge.f32.partialorder %v3277_v5, %v3511_v30  ;;  %v1219_v44 = vsel %vm1218_vm7, %v1215_v20, %v1152_v45  ;;  %vm1220_vm2 = vcmp.lt.s32.totalorder %v1217_v11, %v1154_v40  ;;  %vm4278_vm0 = vcmp.ge.f32.partialorder %v3289_v37, %v3511_v30 }
 0x25b   : > { %v1156_v2 = vsel %vm4277_vm3, %v3008_v24, 128  ;;  %v1158_v38 = vsel %vm4278_vm0, %v3017_v31, 128  ;;  %v1221_v34 = vsel %vm1220_vm2, %v1217_v11, %v1154_v40  ;;  %vm4279_vm11 = vcmp.ge.f32.partialorder %v3295_v13, %v3511_v30 }
 0x25c   : > { %vm1222_vm15 = vcmp.lt.s32.totalorder %v1219_v44, %v1156_v2  ;;  %v1160_v9 = vsel %vm4279_vm11, %v3020_v32, 128  ;;  %vm1224_vm6 = vcmp.lt.s32.totalorder %v1221_v34, %v1158_v38  ;;  %vm727_vm7 = vcmp.eq.s32.totalorder %v3061_v58, %v3312_v29 }
 0x25d   : > { %v1223_v35 = vsel %vm1222_vm15, %v1219_v44, %v1156_v2  ;;  %vm4280_vm3 = vcmp.ge.f32.partialorder %v3301_v61, %v3511_v30  ;;  %v1225_v37 = vsel %vm1224_vm6, %v1221_v34, %v1158_v38  ;;  %vm729_vm0 = vcmp.eq.s32.totalorder %v3064_v60, %v3312_v29 }
 0x25e   : > { %v1162_v5 = vsel %vm4280_vm3, %v3061_v58, 128  ;;  %vm1226_vm2 = vcmp.lt.s32.totalorder %v1223_v35, %v1160_v9  ;;  %vm1199_vm4 = vcmp.lt.s32.totalorder %v1197_v1, %v1198_v50  ;;  %vm4281_vm11 = vcmp.ge.f32.partialorder %v3309_v36, %v3511_v30 }
 0x25f   : > { %v1164_v13 = vsel %vm4281_vm11, %v3064_v60, 128  ;;  %v1227_v49 = vsel %vm1226_vm2, %v1223_v35, %v1160_v9  ;;  %vm1228_vm15 = vcmp.lt.s32.totalorder %v1225_v37, %v1162_v5  ;;  %vm4282_vm12 = vcmp.eq.s32.totalorder %v3017_v31, %v3303_v27  ;;  %vm3737_vm11 = vmpackc.low %vm729_vm0, %vm727_vm7 }
 0x260   : > { %v1229_v46 = vsel %vm1228_vm15, %v1225_v37, %v1162_v5  ;;  %vm1230_vm5 = vcmp.lt.s32.totalorder %v1227_v49, %v1164_v13  ;;  %vm4283_vm6 = vcmp.eq.s32.totalorder %v3020_v32, %v3303_v27  ;;  %v4284_v61 = vmov 0 }
 0x261   : > { %vm3730_vm3 = vmpackc.low %vm4283_vm6, %vm4282_vm12  ;;  %v1231_v29 = vsel %vm1230_vm5, %v1227_v49, %v1164_v13  ;;  %v4286_v36 = vmov 0  ;;  %v1200_v30 = vsel %vm1199_vm4, %v1197_v1, %v1198_v50  ;;  %vm726_vm12 = vcmp.eq.s32.totalorder %v3061_v58, %v3303_v27 }
 0x262   : > { %v4285_v61 = vsel %vm3730_vm3, 4294967295, %v4284_v61  ;;  %2126 = vmatpush1.bf16.xpose.msk.msra.mxu1 %vm3730_vm3, %v4218_v23  ;;  %v4287_v36 = vsel %vm3737_vm11, 4294967295, %v4286_v36  ;;  %vm1232_vm2 = vcmp.lt.s32.totalorder %v1229_v46, %v1231_v29  ;;  %v1201_v3 = vrot.slane %v1200_v30, 1 }
 0x263   : > { %2128 = vmatprep.subr.msk.bf16.mxu1 %vm3737_vm11, %v4218_v23  ;;  %v1233_v17 = vsel %vm1232_vm2, %v1229_v46, %v1231_v29  ;;  %vm728_vm5 = vcmp.eq.s32.totalorder %v3064_v60, %v3303_v27  ;;  %v4288_v7 = vmov 0  ;;  %v4290_v27 = vmov 1.0  }
 0x264   : > { %v1234_v56 = vrot.slane %v1233_v17, 4  ;;  %vm3748_vm7 = vmpackc.low %vm728_vm5, %vm726_vm12  ;;  %vm1202_vm4 = vcmp.lt.s32.totalorder %v1200_v30, %v1201_v3  ;;  %v2595_v57 = vmov 0.0  }
 0x265   : > { %v4289_v7 = vsel %vm3748_vm7, 4294967295, %v4288_v7  ;;  %v3755_v42 = vsel %vm1202_vm4, %v1200_v30, %v1201_v3 }
 0x266   : > { %vm1235_vm15 = vcmp.lt.s32.totalorder %v1233_v17, %v1234_v56  ;;  %vm1243_vm2 = vcmp.eq.s32.totalorder %v2969_v48, %v3755_v42  ;;  %vm1245_vm12 = vcmp.eq.s32.totalorder %v2976_v62, %v3755_v42  ;;  %vm1247_vm3 = vcmp.eq.s32.totalorder %v2979_v0, %v3755_v42 }
 0x267   : > { %v1236_v28 = vsel %vm1235_vm15, %v1233_v17, %v1234_v56  ;;  %vm1249_vm14 = vcmp.eq.s32.totalorder %v2982_v4, %v3755_v42 }
 0x268   : > { %v1237_v47 = vrot.slane %v1236_v28, 2 }
 0x26a   : > { %2130 = vmatpush1.bf16.xpose.msk.msra.mxu1 %vm3748_vm7, %v4218_v23  ;;  %vm1238_vm0 = vcmp.lt.s32.totalorder %v1236_v28, %v1237_v47  ;;  %vm2133_vm7 = vmpackc.low %vm1245_vm12, %vm1243_vm2 }
 0x26b   : > { %v1239_v19 = vsel %vm1238_vm0, %v1236_v28, %v1237_v47 }
 0x26c   : > { %v1240_v33 = vrot.slane %v1239_v19, 1 }
 0x26e   : > { %vm1241_vm6 = vcmp.lt.s32.totalorder %v1239_v19, %v1240_v33 }
 0x26f   : > { %v3757_v15 = vsel %vm1241_vm6, %v1239_v19, %v1240_v33 }
 0x270   : > { %vm1244_vm5 = vcmp.eq.s32.totalorder %v2969_v48, %v3757_v15  ;;  %vm1246_vm15 = vcmp.eq.s32.totalorder %v2976_v62, %v3757_v15  ;;  %vm1248_vm4 = vcmp.eq.s32.totalorder %v2979_v0, %v3757_v15  ;;  %vm1250_vm0 = vcmp.eq.s32.totalorder %v2982_v4, %v3757_v15 }
 0x271   : > { %883 = vmatmul.mubr.f32.vlgmr.msra.gmra.mrb[0].mxu1 %v4290_v27  ;;  %vm2131_vm6 = vmpackc.low %vm1246_vm15, %vm1244_vm5  ;;  %vm1252_vm5 = vcmp.eq.s32.totalorder %v2985_v6, %v3757_v15  ;;  %vm1254_vm2 = vcmp.eq.s32.totalorder %v2988_v8, %v3757_v15  ;;  %v1522_v48 = vcombine.low %v3755_v42, %v3757_v15  ;;  %vm1251_vm15 = vcmp.eq.s32.totalorder %v2985_v6, %v3755_v42 }
 0x272   : > { %1408 = vmatprep.mubr.f32.mxu1 %v2595_v57  ;;  %2132 = vmatprep.subr.msk.bf16.mxu1 %vm2131_vm6, %v4218_v23  ;;  %vm2135_vm11 = vmpackc.low %vm1250_vm0, %vm1248_vm4  ;;  %vm1256_vm4 = vcmp.eq.s32.totalorder %v2991_v12, %v3757_v15  ;;  %vm1258_vm0 = vcmp.eq.s32.totalorder %v2994_v14, %v3757_v15 }
 0x273   : > { %2196 = vmatprep.subr.msk.bf16.mxu0 %vm2131_vm6, %v4218_v23  ;;  %2134 = vmatpush1.bf16.msk.msra.mxu1 %vm2133_vm7, %v4218_v23  ;;  %v1529_v62 = vrot.slane %v1522_v48, %v3345_v26  ;;  %vm2139_vm12 = vmpackc.low %vm1254_vm2, %vm1252_vm5  ;;  %vm1255_vm6 = vcmp.eq.s32.totalorder %v2991_v12, %v3755_v42  ;;  %vm1257_vm5 = vcmp.eq.s32.totalorder %v2994_v14, %v3755_v42 }
 0x274   : > { %2198 = vmatpush1.bf16.xpose.msk.msra.mxu0 %vm2133_vm7, %v4218_v23  ;;  %2136 = vmatprep.subr.msk.bf16.mxu1 %vm2135_vm11, %v4218_v23  ;;  %vm2137_vm7 = vmpackc.low %vm1249_vm14, %vm1247_vm3  ;;  %vm1262_vm2 = vcmp.eq.s32.totalorder %v3000_v18, %v3757_v15 }
 0x275   : > { %2200 = vmatprep.subr.msk.bf16.mxu0 %vm2135_vm11, %v4218_v23  ;;  %vm1253_vm11 = vcmp.eq.s32.totalorder %v2988_v8, %v3755_v42  ;;  %v1536_v0 = vrot.slane %v1529_v62, %v3345_v26  ;;  %vm3812_vm3 = vmpackc.low %vm1258_vm0, %vm1256_vm4  ;;  %vm1264_vm4 = vcmp.eq.s32.totalorder %v3005_v22, %v3757_v15  ;;  %vm1266_vm0 = vcmp.eq.s32.totalorder %v3008_v24, %v3757_v15  ;;  %v1343_v26 = vld [vmem:[#allocation7 + $0x38] sm:$0xff] }
 0x276   : > { %vm3801_vm14 = vmpackc.low %vm1253_vm11, %vm1251_vm15  ;;  %vm1261_vm11 = vcmp.eq.s32.totalorder %v3000_v18, %v3755_v42 }
 0x277   : > { %2138 = vmatpush1.bf16.msk.msra.mxu1 %vm2137_vm7, %v4218_v23  ;;  %2050 = vst.msk [vmem:[%s3383_s28 + $0x2] sm:$0x3] %vm3363_vm8, %v1536_v0  ;;  %vm1260_vm8 = vcmp.eq.s32.totalorder %v2997_v16, %v3757_v15 }
 0x278   : > { %2140 = vmatprep.subr.msk.bf16.mxu1 %vm2139_vm12, %v4218_v23  ;;  %vm3835_vm15 = vmpackc.low %vm1262_vm2, %vm1260_vm8  ;;  %vm1263_vm8 = vcmp.eq.s32.totalorder %v3005_v22, %v3755_v42  ;;  %vm1265_vm2 = vcmp.eq.s32.totalorder %v3008_v24, %v3755_v42  ;;  %v4305_v22 = vmov 0 }
 0x27b   : > { %2142 = vmatpush1.bf16.msk.msra.mxu1 %vm3801_vm14, %v4218_v23 }
 0x27c   : > { %2202 = vmatpush1.bf16.xpose.msk.msra.mxu0 %vm2137_vm7, %v4218_v23  ;;  %2144 = vmatprep.subr.msk.bf16.mxu1 %vm3812_vm3, %v4218_v23  ;;  %vm3828_vm7 = vmpackc.low %vm1257_vm5, %vm1255_vm6 }
 0x27d   : > { %2204 = vmatprep.subr.msk.bf16.mxu0 %vm2139_vm12, %v4218_v23  ;;  %vm1259_vm12 = vcmp.eq.s32.totalorder %v2997_v16, %v3755_v42  ;;  %vm3860_vm5 = vmpackc.low %vm1266_vm0, %vm1264_vm4  ;;  %vm1269_vm0 = vcmp.eq.s32.totalorder %v3020_v32, %v3755_v42 }
 0x27e   : > { %vm3850_vm6 = vmpackc.low %vm1261_vm11, %vm1259_vm12  ;;  %vm1270_vm12 = vcmp.eq.s32.totalorder %v3020_v32, %v3757_v15 }
 0x27f   : > { %2146 = vmatpush1.bf16.msk.msra.mxu1 %vm3828_vm7, %v4218_v23  ;;  %vm3878_vm11 = vmpackc.low %vm1265_vm2, %vm1263_vm8  ;;  %vm1272_vm8 = vcmp.eq.s32.totalorder %v3061_v58, %v3757_v15  ;;  %vm1274_vm2 = vcmp.eq.s32.totalorder %v3064_v60, %v3757_v15 }
 0x280   : > { %2148 = vmatprep.subr.msk.bf16.mxu1 %vm3835_vm15, %v4218_v23 }
 0x283   : > { %2150 = vmatpush1.bf16.msk.msra.mxu1 %vm3850_vm6, %v4218_v23 }
 0x284   : > { %2206 = vmatpush1.bf16.xpose.msk.msra.mxu0 %vm3801_vm14, %v4218_v23  ;;  %2152 = vmatprep.subr.msk.bf16.mxu1 %vm3860_vm5, %v4218_v23  ;;  %vm1268_vm14 = vcmp.eq.s32.totalorder %v3017_v31, %v3757_v15 }
 0x285   : > { %2208 = vmatprep.subr.msk.bf16.mxu0 %vm3812_vm3, %v4218_v23  ;;  %vm3885_vm4 = vmpackc.low %vm1270_vm12, %vm1268_vm14  ;;  %vm1267_vm3 = vcmp.eq.s32.totalorder %v3017_v31, %v3755_v42 }
 0x286   : > { %v4306_v22 = vsel %vm3885_vm4, 4294967295, %v4305_v22  ;;  %vm3900_vm14 = vmpackc.low %vm1269_vm0, %vm1267_vm3  ;;  %vm1273_vm3 = vcmp.eq.s32.totalorder %v3064_v60, %v3755_v42  ;;  %v1341_v60 = vld [vmem:[#allocation7 + $0x28] sm:$0xff] }
 0x287   : > { %2154 = vmatpush1.bf16.msk.msra.mxu1 %vm3878_vm11, %v4218_v23  ;;  %vm3910_vm12 = vmpackc.low %vm1274_vm2, %vm1272_vm8  ;;  %vm4326_vm8 = vnez %v4285_v61  ;;  %vm4327_vm2 = vnez %v4287_v36 }
 0x288   : > { %2156 = vmatprep.subr.msk.bf16.mxu1 %vm3885_vm4, %v4218_v23  ;;  %vm1271_vm4 = vcmp.eq.s32.totalorder %v3061_v58, %v3755_v42  ;;  %v1340_v58 = vld [vmem:[#allocation7 + $0x20] sm:$0xff] }
 0x289   : > { %vm3924_vm0 = vmpackc.low %vm1273_vm3, %vm1271_vm4  ;;  %vm4325_vm4 = vnez %v4275_v63 }
 0x28b   : > { %2158 = vmatpush1.bf16.msk.msra.mxu1 %vm3900_vm14, %v4218_v23 }
 0x28c   : > { %2210 = vmatpush1.bf16.xpose.msk.msra.mxu0 %vm3828_vm7, %v4218_v23  ;;  %2160 = vmatprep.subr.msk.bf16.mxu1 %vm3910_vm12, %v4218_v23  ;;  %vm4320_vm7 = vnez %v4246_v25  ;;  %v795_v25 = vld [vmem:[#allocation7 + $0x8] sm:$0xff] }
 0x28d   : > { %2212 = vmatprep.subr.msk.bf16.mxu0 %vm3835_vm15, %v4218_v23  ;;  %vm4321_vm15 = vnez %v4250_v41  ;;  %v796_v41 = vld [vmem:[#allocation7 + $0x10] sm:$0xff] }
 0x28f   : > { %2162 = vmatpush1.bf16.msk.msra.mxu1 %vm3924_vm0, %v4218_v23 }
 0x290   : > { %2164 = vmatprep.subr.msk.bf16.mxu1 %vm3326_vm1, %v4218_v23  ;;  %vm4314_vm1 = vnez %v4313_v53 }
 0x292   : > { %1409 = vmatmul.mubr.f32.vlgmr.msra.gmra.mrb[2].mxu1 %v1340_v58 }
 0x293   : > { %2166 = vmatpush1.bf16.msk.msra.mxu1 %vm3333_vm9, %v4218_v23  ;;  %1414 = vmatprep.mubr.f32.mxu1 %v2595_v57  ;;  %vm4316_vm9 = vnez %v4315_v51 }
 0x294   : > { %2214 = vmatpush1.bf16.xpose.msk.msra.mxu0 %vm3850_vm6, %v4218_v23  ;;  %2168 = vmatprep.subr.msk.bf16.mxu1 %vm3340_vm13, %v4218_v23  ;;  %vm4318_vm13 = vnez %v4317_v54  ;;  %vm4322_vm6 = vnez %v4258_v59  ;;  %v797_v59 = vld [vmem:[#allocation7 + $0x18] sm:$0xff] }
 0x295   : > { %2216 = vmatprep.subr.msk.bf16.mxu0 %vm3860_vm5, %v4218_v23  ;;  %vm4323_vm5 = vnez %v4262_v55 }
 0x296   : > { %1415 = vmatmul.mubr.f32.gmra.mrb[4].mxu1 %v1341_v60 }
 0x297   : > { %2170 = vmatpush1.bf16.msk.msra.mxu1 %vm3368_vm10, %v4218_v23  ;;  %1420 = vmatprep.mubr.f32.mxu1 %v2595_v57  ;;  %vm4319_vm10 = vnez %v4306_v22 }
 0x298   : > { %2172 = vmatprep.subr.msk.bf16.mxu1 %vm4314_vm1, %v4218_v23 }
 0x29a   : > { %1421 = vmatmul.mubr.f32.gmra.mrb[6].mxu1 %v1342_v43 }
 0x29b   : > { %2174 = vmatpush1.bf16.msk.msra.mxu1 %vm4316_vm9, %v4218_v23  ;;  %1426 = vmatprep.mubr.f32.mxu1 %v2595_v57 }
 0x29c   : > { %2218 = vmatpush1.bf16.xpose.msk.msra.mxu0 %vm3878_vm11, %v4218_v23  ;;  %2176 = vmatprep.subr.msk.bf16.mxu1 %vm4318_vm13, %v4218_v23  ;;  %vm4324_vm11 = vnez %v4271_v52 }
 0x29d   : > { %2220 = vmatprep.subr.msk.bf16.mxu0 %vm4319_vm10, %v4218_v23 }
 0x29e   : > { %1427 = vmatmul.mubr.f32.gmra.mrb[8].mxu1 %v1343_v26 }
 0x29f   : > { %2178 = vmatpush1.bf16.msk.msra.mxu1 %vm4320_vm7, %v4218_v23  ;;  %1497 = vmatprep.mubr.f32.mxu1 %v2595_v57 }
 0x2a0   : > { %2180 = vmatprep.subr.msk.bf16.mxu1 %vm4321_vm15, %v4218_v23 }
 0x2a3   : > { %2182 = vmatpush1.bf16.msk.msra.mxu1 %vm4322_vm6, %v4218_v23 }
 0x2a4   : > { %2222 = vmatpush1.bf16.xpose.msk.msra.mxu0 %vm3900_vm14, %v4218_v23  ;;  %2184 = vmatprep.subr.msk.bf16.mxu1 %vm4323_vm5, %v4218_v23  ;;  %vm4328_vm14 = vnez %v4289_v7 }
 0x2a5   : > { %2224 = vmatprep.subr.msk.bf16.mxu0 %vm3910_vm12, %v4218_v23 }
 0x2a7   : > { %2186 = vmatpush1.bf16.msk.msra.mxu1 %vm4324_vm11, %v4218_v23 }
 0x2a8   : > { %2188 = vmatprep.subr.msk.bf16.mxu1 %vm4325_vm4, %v4218_v23 }
 0x2ab   : > { %2190 = vmatpush1.bf16.msk.msra.mxu1 %vm4326_vm8, %v4218_v23 }
 0x2ac   : > { %2226 = vmatpush1.bf16.xpose.msk.msra.mxu0 %vm3924_vm0, %v4218_v23  ;;  %2192 = vmatprep.subr.msk.bf16.mxu1 %vm4327_vm2, %v4218_v23 }
 0x2af   : > { %2194 = vmatpush1.bf16.msk.msra.mxu1 %vm4328_vm14, %v4218_v23 }
 0x2b2   : > { %1498 = vmatmul.mubr.f32.vlgmr.msra.gmra.mrb[2].mxu1 %v794_v21 }
 0x2b3   : > { %1604 = vmatmul.mubr.f32.vlgmr.msra.gmra.mrb[64].mxu0 %v4290_v27  ;;  %1503 = vmatprep.mubr.f32.mxu1 %v2595_v57 }
 0x2b6   : > { %1504 = vmatmul.mubr.f32.gmra.mrb[4].mxu1 %v795_v25 }
 0x2b7   : > { %1509 = vmatprep.mubr.f32.mxu1 %v2595_v57 }
 0x2ba   : > { %1510 = vmatmul.mubr.f32.gmra.mrb[6].mxu1 %v796_v41 }
 0x2bb   : > { %1515 = vmatprep.mubr.f32.mxu1 %v2595_v57 }
 0x2be   : > { %1516 = vmatmul.mubr.f32.gmra.mrb[8].mxu1 %v797_v59 }
 0x2bf   : > { %2447 = shalt.err (!%p2444_p1)
}
 0x2c0   : > { %s2448_s28 = scalar_lea.hbm %s4013_s30, 64  ;;  %s2452_s9 = scalar_lea.hbm %s4150_s4, 128 }
 0x2c1   : > { %p2449_p6 = scmp.ne.s32.totalorder %s4013_s30, %s2448_s28  ;;  %p2453_p4 = scmp.lt.u32.totalorder %s4013_s30, %s4150_s4 }
 0x2c2   : > { %p2454_p9 = scmp.lt.u32.totalorder %s2452_s9, %s2448_s28  ;;  %p2456_p11 = scmp.lt.u32.totalorder %s2448_s28, %s4013_s30 }
 0x2c3   : > { %p2450_p10 = pnand %p2449_p6, %p4329_p2 }
 0x2c4   : > { %p2455_p8 = por %p2454_p9, %p2453_p4 }
 0x2c5   : > { %p2451_p3 = pneg %p2450_p10 }
 0x2c6   : > { %p2457_p13 = por %p2456_p11, %p2455_p8 }
 0x2c8   : > { %p2458_p5 = pnand %p2457_p13, %p2451_p3 }
 0x2ca   : > { %2461 = shalt.err (!%p2458_p5)
}
 0x2cb   : > { %s2597_s8 = smov 32   ;;  %s2598_s14 = smov 2  }
 0x2cc   : > { %2246 = dma.vmem_to_hbm [thread:$0]  (%p4329_p2), %s4016_s6, 64, %s4013_s30, %s4018_s16, %s2597_s8, %s2597_s8, %s2598_s14  }
 0x2cd   : > { %s1869_s26 = sshll.u32 %s2820_s29, 1  ;;  %s2098_s7 = sshll.u32 %s2572_s21, 5 }
 0x2ce   : > { %s311_s17 = scalar_lea.vmem [#allocation11], %s1869_s26  ;;  %s4049_s24 = scalar_lea.hbm %s4151_s5, %s2098_s7 }
 0x2cf   : > { %s1681_s28 = sshll.u32 %s311_s17, 4  ;;  %s4053_s30 = scalar_lea.vmem [#allocation8], %s1864_s13  ;;  %s4044_s28 = int_to_ptr.vmem [resolvable:$true] %s1681_s28 }
 0x2d0   : > { %s2462_s6 = scalar_lea.vmem %s4044_s28, 32  ;;  %s2599_s8 = smov [#allocation11]  }
 0x2d1   : > { %p2463_p7 = scmp.ne.s32.totalorder %s4044_s28, %s2462_s6  ;;  %s2466_s14 = sshll.u32 %s2599_s8, 4  ;;  %s2467_s14 = int_to_ptr.vmem [resolvable:$false] %s2466_s14 }
 0x2d2   : > { %s2468_s26 = scalar_lea.vmem %s2467_s14, 64  ;;  %p2469_p1 = scmp.lt.s32.totalorder %s4044_s28, %s2467_s14 }
 0x2d3   : > { %p2464_p12 = pnand %p2463_p7, %p4329_p2  ;;  %p2470_p6 = scmp.lt.s32.totalorder %s2468_s26, %s2462_s6 }
 0x2d5   : > { %p2465_p0 = pneg %p2464_p12  ;;  %p2471_p10 = por %p2470_p6, %p2469_p1 }
 0x2d7   : > { %p2472_p3 = pnand %p2471_p10, %p2465_p0 }
 0x344   : > { %v884_v23 = vpop.f32.mrb[0].mxu1 }
 0x345   : > { %888 = vst [vmem:[%s311_s17] sm:$0x1] %v884_v23  ;;  %v886_v55 = vpop.f32.mrb[1].mxu1 }
 0x385   : > { %v1499_v1 = vpop.f32.mrb[2].mxu1 }
 0x386   : > { %v1605_v39 = vpop.f32.mrb[64].mxu0  ;;  %1611 = vst [vmem:[%s4053_s30] sm:$0xff] %v1499_v1  ;;  %v1501_v10 = vpop.f32.mrb[3].mxu1 }
 0x387   : > { %2083 = vst [vmem:[%s311_s17 + $0x1] sm:$0x1] %v1605_v39  ;;  %v1607_v52 = vpop.f32.mrb[65].mxu0  ;;  %1612 = vst [vmem:[%s4053_s30 + $0x8] sm:$0xff] %v1501_v10 }
 0x388   : > { %2475 = shalt.err (!%p2472_p3)
}
 0x389   : > { %s2476_s13 = scalar_lea.hbm %s4049_s24, 32  ;;  %s2480_s9 = scalar_lea.hbm %s4151_s5, 64 }
 0x38a   : > { %p2477_p4 = scmp.ne.s32.totalorder %s4049_s24, %s2476_s13  ;;  %p2481_p11 = scmp.lt.u32.totalorder %s4049_s24, %s4151_s5 }
 0x38b   : > { %p2482_p13 = scmp.lt.u32.totalorder %s2480_s9, %s2476_s13  ;;  %p2484_p7 = scmp.lt.u32.totalorder %s2476_s13, %s4049_s24 }
 0x38c   : > { %p2478_p9 = pnand %p2477_p4, %p4329_p2 }
 0x38d   : > { %p2483_p5 = por %p2482_p13, %p2481_p11 }
 0x38e   : > { %p2479_p8 = pneg %p2478_p9 }
 0x38f   : > { %p2485_p12 = por %p2484_p7, %p2483_p5 }
 0x391   : > { %p2486_p0 = pnand %p2485_p12, %p2479_p8 }
 0x393   : > { %2489 = shalt.err (!%p2486_p0)
}
 0x394   : > { %s2600_s6 = smov 16   ;;  %s2601_s14 = smov 1   ;;  %v1505_v45 = vpop.f32.mrb[4].mxu1 }
 0x395   : > { %2247 = dma.vmem_to_hbm [thread:$0]  (%p4329_p2), %s4044_s28, 32, %s4049_s24, %s4018_s16, %s2600_s6, %s2600_s6, %s2601_s14   ;;  %v1507_v20 = vpop.f32.mrb[5].mxu1 }
 0x396   : > { %1613 = vst [vmem:[%s4053_s30 + $0x10] sm:$0xff] %v1505_v45  ;;  %1614 = vst [vmem:[%s4053_s30 + $0x18] sm:$0xff] %v1507_v20  ;;  %s1645_s26 = sshll.u32 %s4053_s30, 4  ;;  %v1511_v63 = vpop.f32.mrb[6].mxu1  ;;  %s2096_s13 = sshll.u32 %s2572_s21, 10  ;;  %s4087_s26 = int_to_ptr.vmem [resolvable:$true] %s1645_s26 }
 0x397   : > { %1615 = vst [vmem:[%s4053_s30 + $0x20] sm:$0xff] %v1511_v63  ;;  %v1513_v40 = vpop.f32.mrb[7].mxu1  ;;  %s4092_s24 = scalar_lea.hbm %s4149_s3, %s2096_s13  ;;  %s1620_s17 = scalar_lea.sflag [#allocation4], %s2820_s29 }
 0x398   : > { %1616 = vst [vmem:[%s4053_s30 + $0x28] sm:$0xff] %v1513_v40  ;;  %v1517_v11 = vpop.f32.mrb[8].mxu1  ;;  %s2490_s7 = scalar_lea.vmem %s4087_s26, 1024  ;;  %s2602_s21 = smov [#allocation8]  }
 0x399   : > { %1617 = vst [vmem:[%s4053_s30 + $0x30] sm:$0xff] %v1517_v11  ;;  %v1519_v50 = vpop.f32.mrb[9].mxu1  ;;  %p2491_p1 = scmp.ne.s32.totalorder %s4087_s26, %s2490_s7  ;;  %s2494_s9 = sshll.u32 %s2602_s21, 4  ;;  %s2495_s9 = int_to_ptr.vmem [resolvable:$false] %s2494_s9 }
 0x39a   : > { %1618 = vst [vmem:[%s4053_s30 + $0x38] sm:$0xff] %v1519_v50  ;;  %s2496_s11 = scalar_lea.vmem %s2495_s9, 2048  ;;  %p2497_p3 = scmp.lt.s32.totalorder %s4087_s26, %s2495_s9 }
 0x39b   : > { %p2492_p6 = pnand %p2491_p1, %p4329_p2  ;;  %p2498_p4 = scmp.lt.s32.totalorder %s2496_s11, %s2490_s7 }
 0x39d   : > { %p2493_p10 = pneg %p2492_p6  ;;  %p2499_p9 = por %p2498_p4, %p2497_p3 }
 0x39f   : > { %p2500_p8 = pnand %p2499_p9, %p2493_p10 }
 0x3a1   : > { %2503 = shalt.err (!%p2500_p8)
}
 0x3a2   : > { %s2504_s30 = scalar_lea.hbm %s4092_s24, 1024  ;;  %s2508_s13 = scalar_lea.hbm %s4149_s3, 2048 }
 0x3a3   : > { %p2505_p11 = scmp.ne.s32.totalorder %s4092_s24, %s2504_s30  ;;  %p2509_p7 = scmp.lt.u32.totalorder %s4092_s24, %s4149_s3 }
 0x3a4   : > { %p2510_p12 = scmp.lt.u32.totalorder %s2508_s13, %s2504_s30  ;;  %p2512_p1 = scmp.lt.u32.totalorder %s2504_s30, %s4092_s24 }
 0x3a5   : > { %p2506_p13 = pnand %p2505_p11, %p4329_p2 }
 0x3a6   : > { %p2511_p0 = por %p2510_p12, %p2509_p7 }
 0x3a7   : > { %p2507_p5 = pneg %p2506_p13 }
 0x3a8   : > { %p2513_p6 = por %p2512_p1, %p2511_p0 }
 0x3aa   : > { %p2514_p10 = pnand %p2513_p6, %p2507_p5 }
 0x3ac   : > { %2517 = shalt.err (!%p2514_p10)
}
 0x3ad   : > { %s2603_s7 = smov 256  }
 0x3ae   : > { %2245 = dma.vmem_to_hbm [thread:$0]  (%p4329_p2), %s4087_s26, 1024, %s4092_s24, %s1620_s17, %s2603_s7, %s2603_s7, %s2600_s6  }
 0x3af PF: > { %s1696_s21 = sand.u32 1, %s2560_s18   ;;  %p4330_p3 = scmp.ne.s32.totalorder %s4184_s27, 0 }
 0x3b0   : > { %p4331_p4 = scmp.ge.s32.totalorder %s2580_s23, 2  ;;  %s1697_s9 = scalar_lea.sflag [#allocation4], %s1696_s21 }
 0x3b2   : > { %p2263_p9 = pnand %p4331_p4, %p4330_p3 }
 0x3b4   : > { %2551 = dma.done.wait (!%p2263_p9), %s1697_s9, 1024  }
 0x3b5   : > { %2553 = vsyncadd (!%p2263_p9), %s1697_s9, 4294966272  ;;  %s1705_s12 = sand.u32 1, %s1855_s25  }
 0x3b6   : > { %s1706_s11 = scalar_lea.sflag [#allocation10], %s1705_s12 }
 0x3b7   : > { %2555 = dma.done.wait (!%p2263_p9), %s1706_s11, 96  }
 0x3b8   : > { %2557 = vsyncadd (!%p2263_p9), %s1706_s11, 4294967200  ;;  %s26_s23 = sadd.s32 1, %s2580_s23   ;;  %s4332_s18 = smov %s2564_s19 }
 0x3b9   : > { %p23_p2 = scmp.ge.s32.totalorder %s26_s23, 4   ;;  %s4333_s19 = smov %s2568_s20 }
 0x3ba   : > { %s4334_s20 = smov %s2774_s15  ;;  %s4335_s21 = smov %s2576_s22 }
 0x3bb   : > { %s4336_s22 = smov %s4338_s10  ;;  %25 = sbr.rel (!%p23_p2) target bundleno = 9 (0x9), region = 121 }
 0x3c2   :  { %1720 = vsyncpa [#allocation3], 1 }
 0x3c3   :  { %1722 = vsyncpa [#allocation3 + $0x1], 1 }
 0x3c4   :  { %1723 = vsyncpa [#allocation6], 1 }
 0x3c5   :  { %1724 = vsyncpa [#allocation4], 1 }
 0x3c6   :  { %1726 = vsyncpa [#allocation4 + $0x1], 1 }
 0x3c7   :  { %1727 = vsyncpa [#allocation10], 1 }
 0x3c8   :  { %1729 = vsyncpa [#allocation10 + $0x1], 1 }

</bundles_post_ra>
